<compile_context>
chip_gen: v7x
topology: tpu7x:2x2x1
jax: 0.10.0
libtpu: 0.0.40
codegen_flags: <defaults>
</compile_context>

<pallas_src>
import functools
import math

import jax
import jax.numpy as jnp
from jax.experimental import pallas as pl
from jax.experimental.pallas import tpu as pltpu

_VMEM = pl.BlockSpec(memory_space=pltpu.MemorySpace.VMEM)


# ----------------------------- in-kernel building blocks -------------------------------

def _causal_conv_stack(x, w_refs, b_refs, metas, pad_ref):
    """Dilated causal Conv1d + bias + ReLU stack on a VMEM-resident value.

    x: (B, T, cin0) f32 value.  pad_ref: shared VMEM scratch used to stage each layer's
    left-zero-padded activation so every tap is a static-slice read (no pad/concat ops).
    metas: tuple of (kernel_size, dilation, cin, cout) per layer (static).
    """
    out = x
    B, T = x.shape[0], x.shape[1]
    for (k, dil, cin, cout), w_ref, b_ref in zip(metas, w_refs, b_refs):
        p = (k - 1) * dil
        # Tap j = k-1 reads the unshifted activation: use `out` directly (no pad_ref round
        # trip; this matmul can issue while the pad-region stores below drain).
        acc = jax.lax.dot_general(
            out, w_ref[k - 1],
            dimension_numbers=(((2,), (0,)), ((), ())),
            preferred_element_type=jnp.float32)
        if k > 1:
            pad_ref[:, :p, :cin] = jnp.zeros((B, p, cin), jnp.float32)
            pad_ref[:, p:p + T, :cin] = out
            for j in range(k - 1):                         # static tap loop (k is 2-3)
                xs = pad_ref[:, j * dil:j * dil + T, :cin]  # (B, T, cin) static slice
                acc = acc + jax.lax.dot_general(
                    xs, w_ref[j],
                    dimension_numbers=(((2,), (0,)), ((), ())),
                    preferred_element_type=jnp.float32)
        # ConvNet always follows Conv1d with nn.ReLU(); nn.Dropout(p) is identity in eval.
        out = jnp.maximum(acc + jnp.reshape(b_ref[...], (1, 1, cout)), 0.0)
    return out


def _fused_kpi_kernel(*refs, t_metas, i_metas, pooling):
    """One kernel = full KpiModel forward up to the logits.

    Ref layout (inputs): [groups (B,W,var_g)] + per temporal layer (w, b) + per inner layer
    (w, b) + decoder (w1 bf16, b1, w2, b2).  Output: logits (B, 2).  Scratch: pad / cat / flat.
    """
    n_groups = len(t_metas)
    idx = 0
    group_refs = refs[idx:idx + n_groups]; idx += n_groups
    t_w, t_b = [], []
    for metas in t_metas:
        ws, bs = [], []
        for _ in metas:
            ws.append(refs[idx]); bs.append(refs[idx + 1]); idx += 2
        t_w.append(ws); t_b.append(bs)
    i_w, i_b = [], []
    for _ in i_metas:
        i_w.append(refs[idx]); i_b.append(refs[idx + 1]); idx += 2
    w1_ref, b1_ref, w2_ref, b2_ref = refs[idx:idx + 4]; idx += 4
    logits_ref = refs[idx]; idx += 1
    pad_ref, cat_ref, flat_ref = refs[idx:idx + 3]

    W = group_refs[0].shape[1]

    # --- KpiEncoder ('by_aspect'): one temporal ConvNet per aspect group. ---------------
    # nn.MaxPool1d(num_channels[-1]) is applied to the permuted (B, T, C) tensor, i.e. it
    # pools the channel (last) axis down to 1 — fused here into the conv epilogue.
    # torch.cat(group_encodings, dim=-1) is realised as lane-offset stores into VMEM scratch.
    off = 0
    for g in range(n_groups):
        enc = _causal_conv_stack(group_refs[g][...], t_w[g], t_b[g], t_metas[g], pad_ref)
        if pooling:
            enc = jnp.max(enc, axis=-1, keepdims=True)        # (B, W, 1)
        td = enc.shape[2]
        cat_ref[:, :, off:off + td] = enc
        off += td

    # --- InnerEncoder (ConvNet, pooling=False) ------------------------------------------
    kpi_re = _causal_conv_stack(cat_ref[...], i_w, i_b, i_metas, pad_ref)   # (B, W, hidden)

    # --- Decoder head: flatten -> Linear -> ReLU -> Linear(2) ---------------------------
    hidden = kpi_re.shape[2]
    for t in range(W):       # in-VMEM flatten via lane-offset stores (lane-dense (B, W*hidden))
        flat_ref[:, t * hidden:(t + 1) * hidden] = kpi_re[:, t, :]
    h = jax.lax.dot_general(                                   # bf16 MXU matmul, f32 accumulate
        flat_ref[...].astype(jnp.bfloat16), w1_ref[...],
        dimension_numbers=(((1,), (0,)), ((), ())),
        preferred_element_type=jnp.float32)
    h = jnp.maximum(h + b1_ref[...], 0.0)                      # bias + ReLU in f32 (v5e-safe)
    # TODO(synk): second matmul has only 2 output columns; one tiny MXU op per forward,
    # negligible at this size (would pad N toward 128 only if this head ever grows).
    logits_ref[...] = (jnp.dot(h, w2_ref[...], preferred_element_type=jnp.float32)
                       + b2_ref[...])


# ----------------------------- fused-kernel wrapper -------------------------------------

def _cost_estimate(arch, B, W, inputs):
    flops = 0
    for metas in list(arch['t_metas']) + [tuple(arch['i_metas'])]:
        for (k, _d, cin, cout) in metas:
            flops += 2 * B * W * k * cin * cout
    flat = W * arch['hidden']
    h2 = flat // 2
    flops += 2 * B * (flat * h2 + h2 * 2)
    bytes_accessed = sum(int(x.size) * x.dtype.itemsize for x in inputs) + B * 2 * 4
    return pl.CostEstimate(flops=int(flops), transcendentals=0,
                           bytes_accessed=int(bytes_accessed))


def fused_kpi_logits(params, groups, arch):
    """groups: list of (B, W, var_g) f32 arrays (already channels-last)."""
    t_metas, i_metas, pooling = arch['t_metas'], arch['i_metas'], arch['pooling']
    B, W = groups[0].shape[0], groups[0].shape[1]
    hidden = i_metas[-1][3]

    inputs = list(groups)
    for g_layers in params['t_encoders']:
        for layer in g_layers:
            inputs += [layer['w'], layer['b']]
    for layer in params['i_encoder']:
        inputs += [layer['w'], layer['b']]
    dec = params['decoder']
    inputs += [dec['w1'], dec['b1'], dec['w2'], dec['b2']]

    all_metas = [m for metas in t_metas for m in metas] + list(i_metas)
    max_tpad = max(W + (k - 1) * d for (k, d, _, _) in all_metas)
    max_cin = max(ci for (_, _, ci, _) in all_metas)

    kernel = functools.partial(_fused_kpi_kernel, t_metas=t_metas, i_metas=i_metas,
                               pooling=pooling)
    return pl.pallas_call(
        kernel,
        out_shape=jax.ShapeDtypeStruct((B, 2), jnp.float32),
        in_specs=[_VMEM] * len(inputs),
        out_specs=_VMEM,
        scratch_shapes=[
            pltpu.VMEM((B, max_tpad, max_cin), jnp.float32),      # shared causal-pad staging
            pltpu.VMEM((B, W, arch['cat_width']), jnp.float32),   # torch.cat(dim=-1) staging
            pltpu.VMEM((B, W * hidden), jnp.float32),             # flatten staging (lane-dense)
        ],
        cost_estimate=_cost_estimate(arch, B, W, inputs),
    )(*inputs)


# ----------------------------- parameter init (deterministic) ---------------------------

def init_convnet(key, num_inputs, num_channels, kernel_sizes, dilation=2):
    layers, metas = [], []
    in_c = num_inputs
    for i, (out_c, ks) in enumerate(zip(num_channels, kernel_sizes)):
        key, kw, kb = jax.random.split(key, 3)
        bound = 1.0 / math.sqrt(in_c * ks)        # PyTorch Conv1d default U(-1/sqrt(fan), .)
        w = jax.random.uniform(kw, (ks, in_c, out_c), jnp.float32, -bound, bound)
        b = jax.random.uniform(kb, (1, out_c), jnp.float32, -bound, bound)
        layers.append({'w': w, 'b': b})
        metas.append((ks, dilation ** i, in_c, out_c))
        in_c = out_c
    return layers, tuple(metas), key


def init_kpi_model(key, var_nums, cfg):
    assert cfg['kpi_architect'] == 'by_aspect'
    group_num = len(var_nums)
    t_hidden = list(cfg['temporal_hidden_sizes'])
    t_kernels = cfg['temporal_kernel_sizes']
    i_hidden = list(cfg['inner_hidden_sizes'])
    i_hidden[-1] = cfg['hidden_size']             # InnerEncoder overwrites last dim
    i_kernels = cfg['inner_kernel_sizes']
    pooling = cfg['pooling']
    temporal_dim = 1 if pooling else t_hidden[-1]

    t_encoders, t_metas = [], []
    for var in var_nums:
        layers, metas, key = init_convnet(key, var, t_hidden, t_kernels)
        t_encoders.append(layers); t_metas.append(metas)
    i_encoder, i_metas, key = init_convnet(key, group_num * temporal_dim, i_hidden, i_kernels)

    # TODO(synk): Decoder class body is not included in the reference listing; approximated
    # as flatten -> Linear(W*H, W*H//2) -> ReLU -> Linear(-> 2) binary classification head.
    flat = cfg['window_size'] * cfg['hidden_size']
    h2 = flat // 2
    key, k1, k2, k3, k4 = jax.random.split(key, 5)
    bd1 = 1.0 / math.sqrt(flat)
    bd2 = 1.0 / math.sqrt(h2)
    decoder = {
        # bf16 for the only non-trivial operand (MXU-native input, halves the w1 DMA);
        # accumulation stays f32 via preferred_element_type inside the kernel.
        'w1': jax.random.uniform(k1, (flat, h2), jnp.float32, -bd1, bd1).astype(jnp.bfloat16),
        'b1': jax.random.uniform(k2, (1, h2), jnp.float32, -bd1, bd1),
        'w2': jax.random.uniform(k3, (h2, 2), jnp.float32, -bd2, bd2),
        'b2': jax.random.uniform(k4, (1, 2), jnp.float32, -bd2, bd2),
    }
    params = {'t_encoders': t_encoders, 'i_encoder': i_encoder, 'decoder': decoder}
    arch = {'t_metas': tuple(t_metas), 'i_metas': i_metas, 'pooling': pooling,
            'window': cfg['window_size'], 'hidden': cfg['hidden_size'],
            'cat_width': group_num * temporal_dim}
    return params, arch


# ----------------------------- forward pass ----------------------------------------------

def make_kpi_forward(arch):
    def forward(params, kpi_features, label, flag=False):
        y = label.astype(jnp.int32).reshape(-1)
        # TemporalEncoder casts to float; ConvNet permutes to channels-last before the net.
        groups = [jnp.transpose(g, (0, 2, 1)).astype(jnp.float32) for g in kpi_features]
        logits = fused_kpi_logits(params, groups, arch)                 # (B, 2) — one kernel
        if y.shape[0] == 1:
            logits = logits.reshape(1, -1)
        if flag:
            y_pred = jnp.argmax(logits, axis=1)
            conf = jnp.max(jax.nn.softmax(logits, axis=1), axis=1)
            return {'y_pred': y_pred, 'conf': conf}
        # nn.CrossEntropyLoss (mean reduction)
        logp = jax.nn.log_softmax(logits, axis=1)
        loss = -jnp.mean(jnp.take_along_axis(logp, y[:, None], axis=1))
        return {'loss': loss}
    return forward


# ----------------------------- demo -------------------------------------------------------

if __name__ == "__main__":
    cfg = dict(
        kpi_architect='by_aspect',
        window_size=16,
        hidden_size=32,
        temporal_hidden_sizes=[8, 8],
        temporal_kernel_sizes=[3, 3],
        temporal_dropout=0.0,
        inner_hidden_sizes=[16, 32],
        inner_kernel_sizes=[3, 3],
        inner_dropout=0.0,
        pooling=True,
    )
    var_nums = [3, 2]
    batch = 2   # NOTE: for real serving, batch many windows so B*T >= 128 (MXU/vreg utilization)

    key = jax.random.PRNGKey(0)
    key, kp = jax.random.split(key)
    params, arch = init_kpi_model(kp, var_nums, cfg)

    feats = []
    for v in var_nums:
        key, kf = jax.random.split(key)
        feats.append(jax.random.normal(kf, (batch, v, cfg['window_size']), jnp.float32))
    key, kl = jax.random.split(key)
    label = jax.random.randint(kl, (batch,), 0, 2)

    forward = jax.jit(make_kpi_forward(arch), static_argnames=('flag',))
    out = forward(params, feats, label, flag=False)
    loss = jax.block_until_ready(out['loss'])
    assert bool(jnp.isfinite(loss))
    print("KERNEL_OK")
</pallas_src>

<mosaic_0001>
module attributes {stable_mosaic.version = 11 : i64} {
  func.func @_fused_kpi_kernel(%arg0: memref<2x16x3xf32, #tpu.memory_space<vmem>>, %arg1: memref<2x16x2xf32, #tpu.memory_space<vmem>>, %arg2: memref<3x3x8xf32, #tpu.memory_space<vmem>>, %arg3: memref<1x8xf32, #tpu.memory_space<vmem>>, %arg4: memref<3x8x8xf32, #tpu.memory_space<vmem>>, %arg5: memref<1x8xf32, #tpu.memory_space<vmem>>, %arg6: memref<3x2x8xf32, #tpu.memory_space<vmem>>, %arg7: memref<1x8xf32, #tpu.memory_space<vmem>>, %arg8: memref<3x8x8xf32, #tpu.memory_space<vmem>>, %arg9: memref<1x8xf32, #tpu.memory_space<vmem>>, %arg10: memref<3x2x16xf32, #tpu.memory_space<vmem>>, %arg11: memref<1x16xf32, #tpu.memory_space<vmem>>, %arg12: memref<3x16x32xf32, #tpu.memory_space<vmem>>, %arg13: memref<1x32xf32, #tpu.memory_space<vmem>>, %arg14: memref<512x256xbf16, #tpu.memory_space<vmem>>, %arg15: memref<1x256xf32, #tpu.memory_space<vmem>>, %arg16: memref<256x2xf32, #tpu.memory_space<vmem>>, %arg17: memref<1x2xf32, #tpu.memory_space<vmem>>, %arg18: memref<2x2xf32, #tpu.memory_space<vmem>>, %arg19: memref<2x20x16xf32, #tpu.memory_space<vmem>>, %arg20: memref<2x16x2xf32, #tpu.memory_space<vmem>>, %arg21: memref<2x512xf32, #tpu.memory_space<vmem>>) attributes {dimension_semantics = [], scalar_prefetch = 0 : i64, scratch_operands = 3 : i64, tpu.core_type = #tpu.core_type<tc>} {
    %c0 = arith.constant 0 : index
    %c0_0 = arith.constant 0 : index
    %c0_1 = arith.constant 0 : index
    %0 = vector.load %arg0[%c0, %c0_0, %c0_1] : memref<2x16x3xf32, #tpu.memory_space<vmem>>, vector<2x16x3xf32>
    %c2 = arith.constant 2 : index
    %c0_2 = arith.constant 0 : index
    %c0_3 = arith.constant 0 : index
    %1 = vector.load %arg2[%c2, %c0_2, %c0_3] : memref<3x3x8xf32, #tpu.memory_space<vmem>>, vector<1x3x8xf32>
    %2 = vector.shape_cast %1 : vector<1x3x8xf32> to vector<3x8xf32>
    %cst = arith.constant dense<0.000000e+00> : vector<2x16x8xf32>
    %3 = tpu.matmul %0, %2, %cst {dimension_numbers = #tpu.dot_dimension_numbers<[2], [0], [0, 1], [1], [0, 0, 0, 1, 1, 1], [], []>} : vector<2x16x3xf32>, vector<3x8xf32>, vector<2x16x8xf32> -> vector<2x16x8xf32>
    %cst_4 = arith.constant 0.000000e+00 : f32
    %4 = vector.broadcast %cst_4 : f32 to vector<2x2x3xf32>
    %c0_5 = arith.constant 0 : index
    %c0_6 = arith.constant 0 : index
    %c0_7 = arith.constant 0 : index
    %5 = vector.load %arg19[%c0_5, %c0_6, %c0_7] : memref<2x20x16xf32, #tpu.memory_space<vmem>>, vector<2x2x3xf32>
    tpu.vector_store %arg19[%c0_5, %c0_6, %c0_7], %4 {strides = array<i32>} : memref<2x20x16xf32, #tpu.memory_space<vmem>>, vector<2x2x3xf32>,
    %c0_8 = arith.constant 0 : index
    %c2_9 = arith.constant 2 : index
    %c0_10 = arith.constant 0 : index
    %6 = vector.load %arg19[%c0_8, %c2_9, %c0_10] : memref<2x20x16xf32, #tpu.memory_space<vmem>>, vector<2x16x3xf32>
    tpu.vector_store %arg19[%c0_8, %c2_9, %c0_10], %0 {strides = array<i32>} : memref<2x20x16xf32, #tpu.memory_space<vmem>>, vector<2x16x3xf32>,
    %c0_11 = arith.constant 0 : index
    %c0_12 = arith.constant 0 : index
    %c0_13 = arith.constant 0 : index
    %7 = vector.load %arg19[%c0_11, %c0_12, %c0_13] : memref<2x20x16xf32, #tpu.memory_space<vmem>>, vector<2x16x3xf32>
    %c0_14 = arith.constant 0 : index
    %c0_15 = arith.constant 0 : index
    %c0_16 = arith.constant 0 : index
    %8 = vector.load %arg2[%c0_14, %c0_15, %c0_16] : memref<3x3x8xf32, #tpu.memory_space<vmem>>, vector<1x3x8xf32>
    %9 = vector.shape_cast %8 : vector<1x3x8xf32> to vector<3x8xf32>
    %cst_17 = arith.constant dense<0.000000e+00> : vector<2x16x8xf32>
    %10 = tpu.matmul %7, %9, %cst_17 {dimension_numbers = #tpu.dot_dimension_numbers<[2], [0], [0, 1], [1], [0, 0, 0, 1, 1, 1], [], []>} : vector<2x16x3xf32>, vector<3x8xf32>, vector<2x16x8xf32> -> vector<2x16x8xf32>
    %11 = arith.addf %3, %10 : vector<2x16x8xf32>
    %c0_18 = arith.constant 0 : index
    %c1 = arith.constant 1 : index
    %c0_19 = arith.constant 0 : index
    %12 = vector.load %arg19[%c0_18, %c1, %c0_19] : memref<2x20x16xf32, #tpu.memory_space<vmem>>, vector<2x16x3xf32>
    %c1_20 = arith.constant 1 : index
    %c0_21 = arith.constant 0 : index
    %c0_22 = arith.constant 0 : index
    %13 = vector.load %arg2[%c1_20, %c0_21, %c0_22] : memref<3x3x8xf32, #tpu.memory_space<vmem>>, vector<1x3x8xf32>
    %14 = vector.shape_cast %13 : vector<1x3x8xf32> to vector<3x8xf32>
    %cst_23 = arith.constant dense<0.000000e+00> : vector<2x16x8xf32>
    %15 = tpu.matmul %12, %14, %cst_23 {dimension_numbers = #tpu.dot_dimension_numbers<[2], [0], [0, 1], [1], [0, 0, 0, 1, 1, 1], [], []>} : vector<2x16x3xf32>, vector<3x8xf32>, vector<2x16x8xf32> -> vector<2x16x8xf32>
    %16 = arith.addf %11, %15 : vector<2x16x8xf32>
    %c0_24 = arith.constant 0 : index
    %c0_25 = arith.constant 0 : index
    %17 = vector.load %arg3[%c0_24, %c0_25] : memref<1x8xf32, #tpu.memory_space<vmem>>, vector<1x8xf32>
    %18 = vector.shape_cast %17 : vector<1x8xf32> to vector<1x1x8xf32>
    %19 = vector.broadcast %18 : vector<1x1x8xf32> to vector<2x16x8xf32>
    %20 = arith.addf %16, %19 : vector<2x16x8xf32>
    %cst_26 = arith.constant 0.000000e+00 : f32
    %21 = vector.broadcast %cst_26 : f32 to vector<2x16x8xf32>
    %22 = arith.maximumf %20, %21 : vector<2x16x8xf32>
    %c2_27 = arith.constant 2 : index
    %c0_28 = arith.constant 0 : index
    %c0_29 = arith.constant 0 : index
    %23 = vector.load %arg4[%c2_27, %c0_28, %c0_29] : memref<3x8x8xf32, #tpu.memory_space<vmem>>, vector<1x8x8xf32>
    %24 = vector.shape_cast %23 : vector<1x8x8xf32> to vector<8x8xf32>
    %cst_30 = arith.constant dense<0.000000e+00> : vector<2x16x8xf32>
    %25 = tpu.matmul %22, %24, %cst_30 {dimension_numbers = #tpu.dot_dimension_numbers<[2], [0], [0, 1], [1], [0, 0, 0, 1, 1, 1], [], []>} : vector<2x16x8xf32>, vector<8x8xf32>, vector<2x16x8xf32> -> vector<2x16x8xf32>
    %cst_31 = arith.constant 0.000000e+00 : f32
    %26 = vector.broadcast %cst_31 : f32 to vector<2x4x8xf32>
    %c0_32 = arith.constant 0 : index
    %c0_33 = arith.constant 0 : index
    %c0_34 = arith.constant 0 : index
    %27 = vector.load %arg19[%c0_32, %c0_33, %c0_34] : memref<2x20x16xf32, #tpu.memory_space<vmem>>, vector<2x4x8xf32>
    tpu.vector_store %arg19[%c0_32, %c0_33, %c0_34], %26 {strides = array<i32>} : memref<2x20x16xf32, #tpu.memory_space<vmem>>, vector<2x4x8xf32>,
    %c0_35 = arith.constant 0 : index
    %c4 = arith.constant 4 : index
    %c0_36 = arith.constant 0 : index
    %28 = vector.load %arg19[%c0_35, %c4, %c0_36] : memref<2x20x16xf32, #tpu.memory_space<vmem>>, vector<2x16x8xf32>
    tpu.vector_store %arg19[%c0_35, %c4, %c0_36], %22 {strides = array<i32>} : memref<2x20x16xf32, #tpu.memory_space<vmem>>, vector<2x16x8xf32>,
    %c0_37 = arith.constant 0 : index
    %c0_38 = arith.constant 0 : index
    %c0_39 = arith.constant 0 : index
    %29 = vector.load %arg19[%c0_37, %c0_38, %c0_39] : memref<2x20x16xf32, #tpu.memory_space<vmem>>, vector<2x16x8xf32>
    %c0_40 = arith.constant 0 : index
    %c0_41 = arith.constant 0 : index
    %c0_42 = arith.constant 0 : index
    %30 = vector.load %arg4[%c0_40, %c0_41, %c0_42] : memref<3x8x8xf32, #tpu.memory_space<vmem>>, vector<1x8x8xf32>
    %31 = vector.shape_cast %30 : vector<1x8x8xf32> to vector<8x8xf32>
    %cst_43 = arith.constant dense<0.000000e+00> : vector<2x16x8xf32>
    %32 = tpu.matmul %29, %31, %cst_43 {dimension_numbers = #tpu.dot_dimension_numbers<[2], [0], [0, 1], [1], [0, 0, 0, 1, 1, 1], [], []>} : vector<2x16x8xf32>, vector<8x8xf32>, vector<2x16x8xf32> -> vector<2x16x8xf32>
    %33 = arith.addf %25, %32 : vector<2x16x8xf32>
    %c0_44 = arith.constant 0 : index
    %c2_45 = arith.constant 2 : index
    %c0_46 = arith.constant 0 : index
    %34 = vector.load %arg19[%c0_44, %c2_45, %c0_46] : memref<2x20x16xf32, #tpu.memory_space<vmem>>, vector<2x16x8xf32>
    %c1_47 = arith.constant 1 : index
    %c0_48 = arith.constant 0 : index
    %c0_49 = arith.constant 0 : index
    %35 = vector.load %arg4[%c1_47, %c0_48, %c0_49] : memref<3x8x8xf32, #tpu.memory_space<vmem>>, vector<1x8x8xf32>
    %36 = vector.shape_cast %35 : vector<1x8x8xf32> to vector<8x8xf32>
    %cst_50 = arith.constant dense<0.000000e+00> : vector<2x16x8xf32>
    %37 = tpu.matmul %34, %36, %cst_50 {dimension_numbers = #tpu.dot_dimension_numbers<[2], [0], [0, 1], [1], [0, 0, 0, 1, 1, 1], [], []>} : vector<2x16x8xf32>, vector<8x8xf32>, vector<2x16x8xf32> -> vector<2x16x8xf32>
    %38 = arith.addf %33, %37 : vector<2x16x8xf32>
    %c0_51 = arith.constant 0 : index
    %c0_52 = arith.constant 0 : index
    %39 = vector.load %arg5[%c0_51, %c0_52] : memref<1x8xf32, #tpu.memory_space<vmem>>, vector<1x8xf32>
    %40 = vector.shape_cast %39 : vector<1x8xf32> to vector<1x1x8xf32>
    %41 = vector.broadcast %40 : vector<1x1x8xf32> to vector<2x16x8xf32>
    %42 = arith.addf %38, %41 : vector<2x16x8xf32>
    %cst_53 = arith.constant 0.000000e+00 : f32
    %43 = vector.broadcast %cst_53 : f32 to vector<2x16x8xf32>
    %44 = arith.maximumf %42, %43 : vector<2x16x8xf32>
    %cst_54 = arith.constant dense<0xFF800000> : vector<2x16xf32>
    %45 = vector.multi_reduction <maximumf>, %44, %cst_54 [2] : vector<2x16x8xf32> to vector<2x16xf32>
    %46 = vector.shape_cast %45 : vector<2x16xf32> to vector<2x16x1xf32>
    %c0_55 = arith.constant 0 : index
    %c0_56 = arith.constant 0 : index
    %c0_57 = arith.constant 0 : index
    %47 = vector.load %arg20[%c0_55, %c0_56, %c0_57] : memref<2x16x2xf32, #tpu.memory_space<vmem>>, vector<2x16x1xf32>
    tpu.vector_store %arg20[%c0_55, %c0_56, %c0_57], %46 {strides = array<i32>} : memref<2x16x2xf32, #tpu.memory_space<vmem>>, vector<2x16x1xf32>,
    %c0_58 = arith.constant 0 : index
    %c0_59 = arith.constant 0 : index
    %c0_60 = arith.constant 0 : index
    %48 = vector.load %arg1[%c0_58, %c0_59, %c0_60] : memref<2x16x2xf32, #tpu.memory_space<vmem>>, vector<2x16x2xf32>
    %c2_61 = arith.constant 2 : index
    %c0_62 = arith.constant 0 : index
    %c0_63 = arith.constant 0 : index
    %49 = vector.load %arg6[%c2_61, %c0_62, %c0_63] : memref<3x2x8xf32, #tpu.memory_space<vmem>>, vector<1x2x8xf32>
    %50 = vector.shape_cast %49 : vector<1x2x8xf32> to vector<2x8xf32>
    %cst_64 = arith.constant dense<0.000000e+00> : vector<2x16x8xf32>
    %51 = tpu.matmul %48, %50, %cst_64 {dimension_numbers = #tpu.dot_dimension_numbers<[2], [0], [0, 1], [1], [0, 0, 0, 1, 1, 1], [], []>} : vector<2x16x2xf32>, vector<2x8xf32>, vector<2x16x8xf32> -> vector<2x16x8xf32>
    %cst_65 = arith.constant 0.000000e+00 : f32
    %52 = vector.broadcast %cst_65 : f32 to vector<2x2x2xf32>
    %c0_66 = arith.constant 0 : index
    %c0_67 = arith.constant 0 : index
    %c0_68 = arith.constant 0 : index
    %53 = vector.load %arg19[%c0_66, %c0_67, %c0_68] : memref<2x20x16xf32, #tpu.memory_space<vmem>>, vector<2x2x2xf32>
    tpu.vector_store %arg19[%c0_66, %c0_67, %c0_68], %52 {strides = array<i32>} : memref<2x20x16xf32, #tpu.memory_space<vmem>>, vector<2x2x2xf32>,
    %c0_69 = arith.constant 0 : index
    %c2_70 = arith.constant 2 : index
    %c0_71 = arith.constant 0 : index
    %54 = vector.load %arg19[%c0_69, %c2_70, %c0_71] : memref<2x20x16xf32, #tpu.memory_space<vmem>>, vector<2x16x2xf32>
    tpu.vector_store %arg19[%c0_69, %c2_70, %c0_71], %48 {strides = array<i32>} : memref<2x20x16xf32, #tpu.memory_space<vmem>>, vector<2x16x2xf32>,
    %c0_72 = arith.constant 0 : index
    %c0_73 = arith.constant 0 : index
    %c0_74 = arith.constant 0 : index
    %55 = vector.load %arg19[%c0_72, %c0_73, %c0_74] : memref<2x20x16xf32, #tpu.memory_space<vmem>>, vector<2x16x2xf32>
    %c0_75 = arith.constant 0 : index
    %c0_76 = arith.constant 0 : index
    %c0_77 = arith.constant 0 : index
    %56 = vector.load %arg6[%c0_75, %c0_76, %c0_77] : memref<3x2x8xf32, #tpu.memory_space<vmem>>, vector<1x2x8xf32>
    %57 = vector.shape_cast %56 : vector<1x2x8xf32> to vector<2x8xf32>
    %cst_78 = arith.constant dense<0.000000e+00> : vector<2x16x8xf32>
    %58 = tpu.matmul %55, %57, %cst_78 {dimension_numbers = #tpu.dot_dimension_numbers<[2], [0], [0, 1], [1], [0, 0, 0, 1, 1, 1], [], []>} : vector<2x16x2xf32>, vector<2x8xf32>, vector<2x16x8xf32> -> vector<2x16x8xf32>
    %59 = arith.addf %51, %58 : vector<2x16x8xf32>
    %c0_79 = arith.constant 0 : index
    %c1_80 = arith.constant 1 : index
    %c0_81 = arith.constant 0 : index
    %60 = vector.load %arg19[%c0_79, %c1_80, %c0_81] : memref<2x20x16xf32, #tpu.memory_space<vmem>>, vector<2x16x2xf32>
    %c1_82 = arith.constant 1 : index
    %c0_83 = arith.constant 0 : index
    %c0_84 = arith.constant 0 : index
    %61 = vector.load %arg6[%c1_82, %c0_83, %c0_84] : memref<3x2x8xf32, #tpu.memory_space<vmem>>, vector<1x2x8xf32>
    %62 = vector.shape_cast %61 : vector<1x2x8xf32> to vector<2x8xf32>
    %cst_85 = arith.constant dense<0.000000e+00> : vector<2x16x8xf32>
    %63 = tpu.matmul %60, %62, %cst_85 {dimension_numbers = #tpu.dot_dimension_numbers<[2], [0], [0, 1], [1], [0, 0, 0, 1, 1, 1], [], []>} : vector<2x16x2xf32>, vector<2x8xf32>, vector<2x16x8xf32> -> vector<2x16x8xf32>
    %64 = arith.addf %59, %63 : vector<2x16x8xf32>
    %c0_86 = arith.constant 0 : index
    %c0_87 = arith.constant 0 : index
    %65 = vector.load %arg7[%c0_86, %c0_87] : memref<1x8xf32, #tpu.memory_space<vmem>>, vector<1x8xf32>
    %66 = vector.shape_cast %65 : vector<1x8xf32> to vector<1x1x8xf32>
    %67 = vector.broadcast %66 : vector<1x1x8xf32> to vector<2x16x8xf32>
    %68 = arith.addf %64, %67 : vector<2x16x8xf32>
    %cst_88 = arith.constant 0.000000e+00 : f32
    %69 = vector.broadcast %cst_88 : f32 to vector<2x16x8xf32>
    %70 = arith.maximumf %68, %69 : vector<2x16x8xf32>
    %c2_89 = arith.constant 2 : index
    %c0_90 = arith.constant 0 : index
    %c0_91 = arith.constant 0 : index
    %71 = vector.load %arg8[%c2_89, %c0_90, %c0_91] : memref<3x8x8xf32, #tpu.memory_space<vmem>>, vector<1x8x8xf32>
    %72 = vector.shape_cast %71 : vector<1x8x8xf32> to vector<8x8xf32>
    %cst_92 = arith.constant dense<0.000000e+00> : vector<2x16x8xf32>
    %73 = tpu.matmul %70, %72, %cst_92 {dimension_numbers = #tpu.dot_dimension_numbers<[2], [0], [0, 1], [1], [0, 0, 0, 1, 1, 1], [], []>} : vector<2x16x8xf32>, vector<8x8xf32>, vector<2x16x8xf32> -> vector<2x16x8xf32>
    %cst_93 = arith.constant 0.000000e+00 : f32
    %74 = vector.broadcast %cst_93 : f32 to vector<2x4x8xf32>
    %c0_94 = arith.constant 0 : index
    %c0_95 = arith.constant 0 : index
    %c0_96 = arith.constant 0 : index
    %75 = vector.load %arg19[%c0_94, %c0_95, %c0_96] : memref<2x20x16xf32, #tpu.memory_space<vmem>>, vector<2x4x8xf32>
    tpu.vector_store %arg19[%c0_94, %c0_95, %c0_96], %74 {strides = array<i32>} : memref<2x20x16xf32, #tpu.memory_space<vmem>>, vector<2x4x8xf32>,
    %c0_97 = arith.constant 0 : index
    %c4_98 = arith.constant 4 : index
    %c0_99 = arith.constant 0 : index
    %76 = vector.load %arg19[%c0_97, %c4_98, %c0_99] : memref<2x20x16xf32, #tpu.memory_space<vmem>>, vector<2x16x8xf32>
    tpu.vector_store %arg19[%c0_97, %c4_98, %c0_99], %70 {strides = array<i32>} : memref<2x20x16xf32, #tpu.memory_space<vmem>>, vector<2x16x8xf32>,
    %c0_100 = arith.constant 0 : index
    %c0_101 = arith.constant 0 : index
    %c0_102 = arith.constant 0 : index
    %77 = vector.load %arg19[%c0_100, %c0_101, %c0_102] : memref<2x20x16xf32, #tpu.memory_space<vmem>>, vector<2x16x8xf32>
    %c0_103 = arith.constant 0 : index
    %c0_104 = arith.constant 0 : index
    %c0_105 = arith.constant 0 : index
    %78 = vector.load %arg8[%c0_103, %c0_104, %c0_105] : memref<3x8x8xf32, #tpu.memory_space<vmem>>, vector<1x8x8xf32>
    %79 = vector.shape_cast %78 : vector<1x8x8xf32> to vector<8x8xf32>
    %cst_106 = arith.constant dense<0.000000e+00> : vector<2x16x8xf32>
    %80 = tpu.matmul %77, %79, %cst_106 {dimension_numbers = #tpu.dot_dimension_numbers<[2], [0], [0, 1], [1], [0, 0, 0, 1, 1, 1], [], []>} : vector<2x16x8xf32>, vector<8x8xf32>, vector<2x16x8xf32> -> vector<2x16x8xf32>
    %81 = arith.addf %73, %80 : vector<2x16x8xf32>
    %c0_107 = arith.constant 0 : index
    %c2_108 = arith.constant 2 : index
    %c0_109 = arith.constant 0 : index
    %82 = vector.load %arg19[%c0_107, %c2_108, %c0_109] : memref<2x20x16xf32, #tpu.memory_space<vmem>>, vector<2x16x8xf32>
    %c1_110 = arith.constant 1 : index
    %c0_111 = arith.constant 0 : index
    %c0_112 = arith.constant 0 : index
    %83 = vector.load %arg8[%c1_110, %c0_111, %c0_112] : memref<3x8x8xf32, #tpu.memory_space<vmem>>, vector<1x8x8xf32>
    %84 = vector.shape_cast %83 : vector<1x8x8xf32> to vector<8x8xf32>
    %cst_113 = arith.constant dense<0.000000e+00> : vector<2x16x8xf32>
    %85 = tpu.matmul %82, %84, %cst_113 {dimension_numbers = #tpu.dot_dimension_numbers<[2], [0], [0, 1], [1], [0, 0, 0, 1, 1, 1], [], []>} : vector<2x16x8xf32>, vector<8x8xf32>, vector<2x16x8xf32> -> vector<2x16x8xf32>
    %86 = arith.addf %81, %85 : vector<2x16x8xf32>
    %c0_114 = arith.constant 0 : index
    %c0_115 = arith.constant 0 : index
    %87 = vector.load %arg9[%c0_114, %c0_115] : memref<1x8xf32, #tpu.memory_space<vmem>>, vector<1x8xf32>
    %88 = vector.shape_cast %87 : vector<1x8xf32> to vector<1x1x8xf32>
    %89 = vector.broadcast %88 : vector<1x1x8xf32> to vector<2x16x8xf32>
    %90 = arith.addf %86, %89 : vector<2x16x8xf32>
    %cst_116 = arith.constant 0.000000e+00 : f32
    %91 = vector.broadcast %cst_116 : f32 to vector<2x16x8xf32>
    %92 = arith.maximumf %90, %91 : vector<2x16x8xf32>
    %cst_117 = arith.constant dense<0xFF800000> : vector<2x16xf32>
    %93 = vector.multi_reduction <maximumf>, %92, %cst_117 [2] : vector<2x16x8xf32> to vector<2x16xf32>
    %94 = vector.shape_cast %93 : vector<2x16xf32> to vector<2x16x1xf32>
    %c0_118 = arith.constant 0 : index
    %c0_119 = arith.constant 0 : index
    %c1_120 = arith.constant 1 : index
    %95 = vector.load %arg20[%c0_118, %c0_119, %c1_120] : memref<2x16x2xf32, #tpu.memory_space<vmem>>, vector<2x16x1xf32>
    tpu.vector_store %arg20[%c0_118, %c0_119, %c1_120], %94 {strides = array<i32>} : memref<2x16x2xf32, #tpu.memory_space<vmem>>, vector<2x16x1xf32>,
    %c0_121 = arith.constant 0 : index
    %c0_122 = arith.constant 0 : index
    %c0_123 = arith.constant 0 : index
    %96 = vector.load %arg20[%c0_121, %c0_122, %c0_123] : memref<2x16x2xf32, #tpu.memory_space<vmem>>, vector<2x16x2xf32>
    %c2_124 = arith.constant 2 : index
    %c0_125 = arith.constant 0 : index
    %c0_126 = arith.constant 0 : index
    %97 = vector.load %arg10[%c2_124, %c0_125, %c0_126] : memref<3x2x16xf32, #tpu.memory_space<vmem>>, vector<1x2x16xf32>
    %98 = vector.shape_cast %97 : vector<1x2x16xf32> to vector<2x16xf32>
    %cst_127 = arith.constant dense<0.000000e+00> : vector<2x16x16xf32>
    %99 = tpu.matmul %96, %98, %cst_127 {dimension_numbers = #tpu.dot_dimension_numbers<[2], [0], [0, 1], [1], [0, 0, 0, 1, 1, 1], [], []>} : vector<2x16x2xf32>, vector<2x16xf32>, vector<2x16x16xf32> -> vector<2x16x16xf32>
    %cst_128 = arith.constant 0.000000e+00 : f32
    %100 = vector.broadcast %cst_128 : f32 to vector<2x2x2xf32>
    %c0_129 = arith.constant 0 : index
    %c0_130 = arith.constant 0 : index
    %c0_131 = arith.constant 0 : index
    %101 = vector.load %arg19[%c0_129, %c0_130, %c0_131] : memref<2x20x16xf32, #tpu.memory_space<vmem>>, vector<2x2x2xf32>
    tpu.vector_store %arg19[%c0_129, %c0_130, %c0_131], %100 {strides = array<i32>} : memref<2x20x16xf32, #tpu.memory_space<vmem>>, vector<2x2x2xf32>,
    %c0_132 = arith.constant 0 : index
    %c2_133 = arith.constant 2 : index
    %c0_134 = arith.constant 0 : index
    %102 = vector.load %arg19[%c0_132, %c2_133, %c0_134] : memref<2x20x16xf32, #tpu.memory_space<vmem>>, vector<2x16x2xf32>
    tpu.vector_store %arg19[%c0_132, %c2_133, %c0_134], %96 {strides = array<i32>} : memref<2x20x16xf32, #tpu.memory_space<vmem>>, vector<2x16x2xf32>,
    %c0_135 = arith.constant 0 : index
    %c0_136 = arith.constant 0 : index
    %c0_137 = arith.constant 0 : index
    %103 = vector.load %arg19[%c0_135, %c0_136, %c0_137] : memref<2x20x16xf32, #tpu.memory_space<vmem>>, vector<2x16x2xf32>
    %c0_138 = arith.constant 0 : index
    %c0_139 = arith.constant 0 : index
    %c0_140 = arith.constant 0 : index
    %104 = vector.load %arg10[%c0_138, %c0_139, %c0_140] : memref<3x2x16xf32, #tpu.memory_space<vmem>>, vector<1x2x16xf32>
    %105 = vector.shape_cast %104 : vector<1x2x16xf32> to vector<2x16xf32>
    %cst_141 = arith.constant dense<0.000000e+00> : vector<2x16x16xf32>
    %106 = tpu.matmul %103, %105, %cst_141 {dimension_numbers = #tpu.dot_dimension_numbers<[2], [0], [0, 1], [1], [0, 0, 0, 1, 1, 1], [], []>} : vector<2x16x2xf32>, vector<2x16xf32>, vector<2x16x16xf32> -> vector<2x16x16xf32>
    %107 = arith.addf %99, %106 : vector<2x16x16xf32>
    %c0_142 = arith.constant 0 : index
    %c1_143 = arith.constant 1 : index
    %c0_144 = arith.constant 0 : index
    %108 = vector.load %arg19[%c0_142, %c1_143, %c0_144] : memref<2x20x16xf32, #tpu.memory_space<vmem>>, vector<2x16x2xf32>
    %c1_145 = arith.constant 1 : index
    %c0_146 = arith.constant 0 : index
    %c0_147 = arith.constant 0 : index
    %109 = vector.load %arg10[%c1_145, %c0_146, %c0_147] : memref<3x2x16xf32, #tpu.memory_space<vmem>>, vector<1x2x16xf32>
    %110 = vector.shape_cast %109 : vector<1x2x16xf32> to vector<2x16xf32>
    %cst_148 = arith.constant dense<0.000000e+00> : vector<2x16x16xf32>
    %111 = tpu.matmul %108, %110, %cst_148 {dimension_numbers = #tpu.dot_dimension_numbers<[2], [0], [0, 1], [1], [0, 0, 0, 1, 1, 1], [], []>} : vector<2x16x2xf32>, vector<2x16xf32>, vector<2x16x16xf32> -> vector<2x16x16xf32>
    %112 = arith.addf %107, %111 : vector<2x16x16xf32>
    %c0_149 = arith.constant 0 : index
    %c0_150 = arith.constant 0 : index
    %113 = vector.load %arg11[%c0_149, %c0_150] : memref<1x16xf32, #tpu.memory_space<vmem>>, vector<1x16xf32>
    %114 = vector.shape_cast %113 : vector<1x16xf32> to vector<1x1x16xf32>
    %115 = vector.broadcast %114 : vector<1x1x16xf32> to vector<2x16x16xf32>
    %116 = arith.addf %112, %115 : vector<2x16x16xf32>
    %cst_151 = arith.constant 0.000000e+00 : f32
    %117 = vector.broadcast %cst_151 : f32 to vector<2x16x16xf32>
    %118 = arith.maximumf %116, %117 : vector<2x16x16xf32>
    %c2_152 = arith.constant 2 : index
    %c0_153 = arith.constant 0 : index
    %c0_154 = arith.constant 0 : index
    %119 = vector.load %arg12[%c2_152, %c0_153, %c0_154] : memref<3x16x32xf32, #tpu.memory_space<vmem>>, vector<1x16x32xf32>
    %120 = vector.shape_cast %119 : vector<1x16x32xf32> to vector<16x32xf32>
    %cst_155 = arith.constant dense<0.000000e+00> : vector<2x16x32xf32>
    %121 = tpu.matmul %118, %120, %cst_155 {dimension_numbers = #tpu.dot_dimension_numbers<[2], [0], [0, 1], [1], [0, 0, 0, 1, 1, 1], [], []>} : vector<2x16x16xf32>, vector<16x32xf32>, vector<2x16x32xf32> -> vector<2x16x32xf32>
    %cst_156 = arith.constant 0.000000e+00 : f32
    %122 = vector.broadcast %cst_156 : f32 to vector<2x4x16xf32>
    %c0_157 = arith.constant 0 : index
    %c0_158 = arith.constant 0 : index
    %c0_159 = arith.constant 0 : index
    %123 = vector.load %arg19[%c0_157, %c0_158, %c0_159] : memref<2x20x16xf32, #tpu.memory_space<vmem>>, vector<2x4x16xf32>
    tpu.vector_store %arg19[%c0_157, %c0_158, %c0_159], %122 {strides = array<i32>} : memref<2x20x16xf32, #tpu.memory_space<vmem>>, vector<2x4x16xf32>,
    %c0_160 = arith.constant 0 : index
    %c4_161 = arith.constant 4 : index
    %c0_162 = arith.constant 0 : index
    %124 = vector.load %arg19[%c0_160, %c4_161, %c0_162] : memref<2x20x16xf32, #tpu.memory_space<vmem>>, vector<2x16x16xf32>
    tpu.vector_store %arg19[%c0_160, %c4_161, %c0_162], %118 {strides = array<i32>} : memref<2x20x16xf32, #tpu.memory_space<vmem>>, vector<2x16x16xf32>,
    %c0_163 = arith.constant 0 : index
    %c0_164 = arith.constant 0 : index
    %c0_165 = arith.constant 0 : index
    %125 = vector.load %arg19[%c0_163, %c0_164, %c0_165] : memref<2x20x16xf32, #tpu.memory_space<vmem>>, vector<2x16x16xf32>
    %c0_166 = arith.constant 0 : index
    %c0_167 = arith.constant 0 : index
    %c0_168 = arith.constant 0 : index
    %126 = vector.load %arg12[%c0_166, %c0_167, %c0_168] : memref<3x16x32xf32, #tpu.memory_space<vmem>>, vector<1x16x32xf32>
    %127 = vector.shape_cast %126 : vector<1x16x32xf32> to vector<16x32xf32>
    %cst_169 = arith.constant dense<0.000000e+00> : vector<2x16x32xf32>
    %128 = tpu.matmul %125, %127, %cst_169 {dimension_numbers = #tpu.dot_dimension_numbers<[2], [0], [0, 1], [1], [0, 0, 0, 1, 1, 1], [], []>} : vector<2x16x16xf32>, vector<16x32xf32>, vector<2x16x32xf32> -> vector<2x16x32xf32>
    %129 = arith.addf %121, %128 : vector<2x16x32xf32>
    %c0_170 = arith.constant 0 : index
    %c2_171 = arith.constant 2 : index
    %c0_172 = arith.constant 0 : index
    %130 = vector.load %arg19[%c0_170, %c2_171, %c0_172] : memref<2x20x16xf32, #tpu.memory_space<vmem>>, vector<2x16x16xf32>
    %c1_173 = arith.constant 1 : index
    %c0_174 = arith.constant 0 : index
    %c0_175 = arith.constant 0 : index
    %131 = vector.load %arg12[%c1_173, %c0_174, %c0_175] : memref<3x16x32xf32, #tpu.memory_space<vmem>>, vector<1x16x32xf32>
    %132 = vector.shape_cast %131 : vector<1x16x32xf32> to vector<16x32xf32>
    %cst_176 = arith.constant dense<0.000000e+00> : vector<2x16x32xf32>
    %133 = tpu.matmul %130, %132, %cst_176 {dimension_numbers = #tpu.dot_dimension_numbers<[2], [0], [0, 1], [1], [0, 0, 0, 1, 1, 1], [], []>} : vector<2x16x16xf32>, vector<16x32xf32>, vector<2x16x32xf32> -> vector<2x16x32xf32>
    %134 = arith.addf %129, %133 : vector<2x16x32xf32>
    %c0_177 = arith.constant 0 : index
    %c0_178 = arith.constant 0 : index
    %135 = vector.load %arg13[%c0_177, %c0_178] : memref<1x32xf32, #tpu.memory_space<vmem>>, vector<1x32xf32>
    %136 = vector.shape_cast %135 : vector<1x32xf32> to vector<1x1x32xf32>
    %137 = vector.broadcast %136 : vector<1x1x32xf32> to vector<2x16x32xf32>
    %138 = arith.addf %134, %137 : vector<2x16x32xf32>
    %cst_179 = arith.constant 0.000000e+00 : f32
    %139 = vector.broadcast %cst_179 : f32 to vector<2x16x32xf32>
    %140 = arith.maximumf %138, %139 : vector<2x16x32xf32>
    %141 = vector.extract_strided_slice %140 {offsets = [0, 0, 0], sizes = [2, 1, 32], strides = [1, 1, 1]} : vector<2x16x32xf32> to vector<2x1x32xf32>
    %142 = vector.shape_cast %141 : vector<2x1x32xf32> to vector<2x32xf32>
    %c0_180 = arith.constant 0 : index
    %c0_181 = arith.constant 0 : index
    %143 = vector.load %arg21[%c0_180, %c0_181] : memref<2x512xf32, #tpu.memory_space<vmem>>, vector<2x32xf32>
    tpu.vector_store %arg21[%c0_180, %c0_181], %142 {strides = array<i32>} : memref<2x512xf32, #tpu.memory_space<vmem>>, vector<2x32xf32>,
    %144 = vector.extract_strided_slice %140 {offsets = [0, 1, 0], sizes = [2, 1, 32], strides = [1, 1, 1]} : vector<2x16x32xf32> to vector<2x1x32xf32>
    %145 = vector.shape_cast %144 : vector<2x1x32xf32> to vector<2x32xf32>
    %c0_182 = arith.constant 0 : index
    %c32 = arith.constant 32 : index
    %146 = vector.load %arg21[%c0_182, %c32] : memref<2x512xf32, #tpu.memory_space<vmem>>, vector<2x32xf32>
    tpu.vector_store %arg21[%c0_182, %c32], %145 {strides = array<i32>} : memref<2x512xf32, #tpu.memory_space<vmem>>, vector<2x32xf32>,
    %147 = vector.extract_strided_slice %140 {offsets = [0, 2, 0], sizes = [2, 1, 32], strides = [1, 1, 1]} : vector<2x16x32xf32> to vector<2x1x32xf32>
    %148 = vector.shape_cast %147 : vector<2x1x32xf32> to vector<2x32xf32>
    %c0_183 = arith.constant 0 : index
    %c64 = arith.constant 64 : index
    %149 = vector.load %arg21[%c0_183, %c64] : memref<2x512xf32, #tpu.memory_space<vmem>>, vector<2x32xf32>
    tpu.vector_store %arg21[%c0_183, %c64], %148 {strides = array<i32>} : memref<2x512xf32, #tpu.memory_space<vmem>>, vector<2x32xf32>,
    %150 = vector.extract_strided_slice %140 {offsets = [0, 3, 0], sizes = [2, 1, 32], strides = [1, 1, 1]} : vector<2x16x32xf32> to vector<2x1x32xf32>
    %151 = vector.shape_cast %150 : vector<2x1x32xf32> to vector<2x32xf32>
    %c0_184 = arith.constant 0 : index
    %c96 = arith.constant 96 : index
    %152 = vector.load %arg21[%c0_184, %c96] : memref<2x512xf32, #tpu.memory_space<vmem>>, vector<2x32xf32>
    tpu.vector_store %arg21[%c0_184, %c96], %151 {strides = array<i32>} : memref<2x512xf32, #tpu.memory_space<vmem>>, vector<2x32xf32>,
    %153 = vector.extract_strided_slice %140 {offsets = [0, 4, 0], sizes = [2, 1, 32], strides = [1, 1, 1]} : vector<2x16x32xf32> to vector<2x1x32xf32>
    %154 = vector.shape_cast %153 : vector<2x1x32xf32> to vector<2x32xf32>
    %c0_185 = arith.constant 0 : index
    %c128 = arith.constant 128 : index
    %155 = vector.load %arg21[%c0_185, %c128] : memref<2x512xf32, #tpu.memory_space<vmem>>, vector<2x32xf32>
    tpu.vector_store %arg21[%c0_185, %c128], %154 {strides = array<i32>} : memref<2x512xf32, #tpu.memory_space<vmem>>, vector<2x32xf32>,
    %156 = vector.extract_strided_slice %140 {offsets = [0, 5, 0], sizes = [2, 1, 32], strides = [1, 1, 1]} : vector<2x16x32xf32> to vector<2x1x32xf32>
    %157 = vector.shape_cast %156 : vector<2x1x32xf32> to vector<2x32xf32>
    %c0_186 = arith.constant 0 : index
    %c160 = arith.constant 160 : index
    %158 = vector.load %arg21[%c0_186, %c160] : memref<2x512xf32, #tpu.memory_space<vmem>>, vector<2x32xf32>
    tpu.vector_store %arg21[%c0_186, %c160], %157 {strides = array<i32>} : memref<2x512xf32, #tpu.memory_space<vmem>>, vector<2x32xf32>,
    %159 = vector.extract_strided_slice %140 {offsets = [0, 6, 0], sizes = [2, 1, 32], strides = [1, 1, 1]} : vector<2x16x32xf32> to vector<2x1x32xf32>
    %160 = vector.shape_cast %159 : vector<2x1x32xf32> to vector<2x32xf32>
    %c0_187 = arith.constant 0 : index
    %c192 = arith.constant 192 : index
    %161 = vector.load %arg21[%c0_187, %c192] : memref<2x512xf32, #tpu.memory_space<vmem>>, vector<2x32xf32>
    tpu.vector_store %arg21[%c0_187, %c192], %160 {strides = array<i32>} : memref<2x512xf32, #tpu.memory_space<vmem>>, vector<2x32xf32>,
    %162 = vector.extract_strided_slice %140 {offsets = [0, 7, 0], sizes = [2, 1, 32], strides = [1, 1, 1]} : vector<2x16x32xf32> to vector<2x1x32xf32>
    %163 = vector.shape_cast %162 : vector<2x1x32xf32> to vector<2x32xf32>
    %c0_188 = arith.constant 0 : index
    %c224 = arith.constant 224 : index
    %164 = vector.load %arg21[%c0_188, %c224] : memref<2x512xf32, #tpu.memory_space<vmem>>, vector<2x32xf32>
    tpu.vector_store %arg21[%c0_188, %c224], %163 {strides = array<i32>} : memref<2x512xf32, #tpu.memory_space<vmem>>, vector<2x32xf32>,
    %165 = vector.extract_strided_slice %140 {offsets = [0, 8, 0], sizes = [2, 1, 32], strides = [1, 1, 1]} : vector<2x16x32xf32> to vector<2x1x32xf32>
    %166 = vector.shape_cast %165 : vector<2x1x32xf32> to vector<2x32xf32>
    %c0_189 = arith.constant 0 : index
    %c256 = arith.constant 256 : index
    %167 = vector.load %arg21[%c0_189, %c256] : memref<2x512xf32, #tpu.memory_space<vmem>>, vector<2x32xf32>
    tpu.vector_store %arg21[%c0_189, %c256], %166 {strides = array<i32>} : memref<2x512xf32, #tpu.memory_space<vmem>>, vector<2x32xf32>,
    %168 = vector.extract_strided_slice %140 {offsets = [0, 9, 0], sizes = [2, 1, 32], strides = [1, 1, 1]} : vector<2x16x32xf32> to vector<2x1x32xf32>
    %169 = vector.shape_cast %168 : vector<2x1x32xf32> to vector<2x32xf32>
    %c0_190 = arith.constant 0 : index
    %c288 = arith.constant 288 : index
    %170 = vector.load %arg21[%c0_190, %c288] : memref<2x512xf32, #tpu.memory_space<vmem>>, vector<2x32xf32>
    tpu.vector_store %arg21[%c0_190, %c288], %169 {strides = array<i32>} : memref<2x512xf32, #tpu.memory_space<vmem>>, vector<2x32xf32>,
    %171 = vector.extract_strided_slice %140 {offsets = [0, 10, 0], sizes = [2, 1, 32], strides = [1, 1, 1]} : vector<2x16x32xf32> to vector<2x1x32xf32>
    %172 = vector.shape_cast %171 : vector<2x1x32xf32> to vector<2x32xf32>
    %c0_191 = arith.constant 0 : index
    %c320 = arith.constant 320 : index
    %173 = vector.load %arg21[%c0_191, %c320] : memref<2x512xf32, #tpu.memory_space<vmem>>, vector<2x32xf32>
    tpu.vector_store %arg21[%c0_191, %c320], %172 {strides = array<i32>} : memref<2x512xf32, #tpu.memory_space<vmem>>, vector<2x32xf32>,
    %174 = vector.extract_strided_slice %140 {offsets = [0, 11, 0], sizes = [2, 1, 32], strides = [1, 1, 1]} : vector<2x16x32xf32> to vector<2x1x32xf32>
    %175 = vector.shape_cast %174 : vector<2x1x32xf32> to vector<2x32xf32>
    %c0_192 = arith.constant 0 : index
    %c352 = arith.constant 352 : index
    %176 = vector.load %arg21[%c0_192, %c352] : memref<2x512xf32, #tpu.memory_space<vmem>>, vector<2x32xf32>
    tpu.vector_store %arg21[%c0_192, %c352], %175 {strides = array<i32>} : memref<2x512xf32, #tpu.memory_space<vmem>>, vector<2x32xf32>,
    %177 = vector.extract_strided_slice %140 {offsets = [0, 12, 0], sizes = [2, 1, 32], strides = [1, 1, 1]} : vector<2x16x32xf32> to vector<2x1x32xf32>
    %178 = vector.shape_cast %177 : vector<2x1x32xf32> to vector<2x32xf32>
    %c0_193 = arith.constant 0 : index
    %c384 = arith.constant 384 : index
    %179 = vector.load %arg21[%c0_193, %c384] : memref<2x512xf32, #tpu.memory_space<vmem>>, vector<2x32xf32>
    tpu.vector_store %arg21[%c0_193, %c384], %178 {strides = array<i32>} : memref<2x512xf32, #tpu.memory_space<vmem>>, vector<2x32xf32>,
    %180 = vector.extract_strided_slice %140 {offsets = [0, 13, 0], sizes = [2, 1, 32], strides = [1, 1, 1]} : vector<2x16x32xf32> to vector<2x1x32xf32>
    %181 = vector.shape_cast %180 : vector<2x1x32xf32> to vector<2x32xf32>
    %c0_194 = arith.constant 0 : index
    %c416 = arith.constant 416 : index
    %182 = vector.load %arg21[%c0_194, %c416] : memref<2x512xf32, #tpu.memory_space<vmem>>, vector<2x32xf32>
    tpu.vector_store %arg21[%c0_194, %c416], %181 {strides = array<i32>} : memref<2x512xf32, #tpu.memory_space<vmem>>, vector<2x32xf32>,
    %183 = vector.extract_strided_slice %140 {offsets = [0, 14, 0], sizes = [2, 1, 32], strides = [1, 1, 1]} : vector<2x16x32xf32> to vector<2x1x32xf32>
    %184 = vector.shape_cast %183 : vector<2x1x32xf32> to vector<2x32xf32>
    %c0_195 = arith.constant 0 : index
    %c448 = arith.constant 448 : index
    %185 = vector.load %arg21[%c0_195, %c448] : memref<2x512xf32, #tpu.memory_space<vmem>>, vector<2x32xf32>
    tpu.vector_store %arg21[%c0_195, %c448], %184 {strides = array<i32>} : memref<2x512xf32, #tpu.memory_space<vmem>>, vector<2x32xf32>,
    %186 = vector.extract_strided_slice %140 {offsets = [0, 15, 0], sizes = [2, 1, 32], strides = [1, 1, 1]} : vector<2x16x32xf32> to vector<2x1x32xf32>
    %187 = vector.shape_cast %186 : vector<2x1x32xf32> to vector<2x32xf32>
    %c0_196 = arith.constant 0 : index
    %c480 = arith.constant 480 : index
    %188 = vector.load %arg21[%c0_196, %c480] : memref<2x512xf32, #tpu.memory_space<vmem>>, vector<2x32xf32>
    tpu.vector_store %arg21[%c0_196, %c480], %187 {strides = array<i32>} : memref<2x512xf32, #tpu.memory_space<vmem>>, vector<2x32xf32>,
    %c0_197 = arith.constant 0 : index
    %c0_198 = arith.constant 0 : index
    %189 = vector.load %arg21[%c0_197, %c0_198] : memref<2x512xf32, #tpu.memory_space<vmem>>, vector<2x512xf32>
    %190 = arith.truncf %189 : vector<2x512xf32> to vector<2x512xbf16>
    %c0_199 = arith.constant 0 : index
    %c0_200 = arith.constant 0 : index
    %191 = vector.load %arg14[%c0_199, %c0_200] : memref<512x256xbf16, #tpu.memory_space<vmem>>, vector<512x256xbf16>
    %cst_201 = arith.constant dense<0.000000e+00> : vector<2x256xf32>
    %192 = tpu.matmul %190, %191, %cst_201 {dimension_numbers = #tpu.dot_dimension_numbers<[1], [0], [0], [1], [0, 0, 1, 1], [], []>} : vector<2x512xbf16>, vector<512x256xbf16>, vector<2x256xf32> -> vector<2x256xf32>
    %c0_202 = arith.constant 0 : index
    %c0_203 = arith.constant 0 : index
    %193 = vector.load %arg15[%c0_202, %c0_203] : memref<1x256xf32, #tpu.memory_space<vmem>>, vector<1x256xf32>
    %194 = vector.broadcast %193 : vector<1x256xf32> to vector<2x256xf32>
    %195 = arith.addf %192, %194 : vector<2x256xf32>
    %cst_204 = arith.constant 0.000000e+00 : f32
    %196 = vector.broadcast %cst_204 : f32 to vector<2x256xf32>
    %197 = arith.maximumf %195, %196 : vector<2x256xf32>
    %c0_205 = arith.constant 0 : index
    %c0_206 = arith.constant 0 : index
    %198 = vector.load %arg16[%c0_205, %c0_206] : memref<256x2xf32, #tpu.memory_space<vmem>>, vector<256x2xf32>
    %cst_207 = arith.constant dense<0.000000e+00> : vector<2x2xf32>
    %199 = tpu.matmul %197, %198, %cst_207 {dimension_numbers = #tpu.dot_dimension_numbers<[1], [0], [0], [1], [0, 0, 1, 1], [], []>} : vector<2x256xf32>, vector<256x2xf32>, vector<2x2xf32> -> vector<2x2xf32>
    %c0_208 = arith.constant 0 : index
    %c0_209 = arith.constant 0 : index
    %200 = vector.load %arg17[%c0_208, %c0_209] : memref<1x2xf32, #tpu.memory_space<vmem>>, vector<1x2xf32>
    %201 = vector.broadcast %200 : vector<1x2xf32> to vector<2x2xf32>
    %202 = arith.addf %199, %201 : vector<2x2xf32>
    %c0_210 = arith.constant 0 : index
    %c0_211 = arith.constant 0 : index
    %203 = vector.load %arg18[%c0_210, %c0_211] : memref<2x2xf32, #tpu.memory_space<vmem>>, vector<2x2xf32>
    tpu.vector_store %arg18[%c0_210, %c0_211], %202 {strides = array<i32>} : memref<2x2xf32, #tpu.memory_space<vmem>>, vector<2x2xf32>,
    return
  }
}

</mosaic_0001>

<bundles_post_ra>
// kernel: forward.1
= control target key start
LH: loop header
LB: loop body
LE: loop exit
PB: predicated region body
PF: predicated region fallthrough
CT: control target
= control target key end

     0   :  { %s4330_s0 = inlined_call_operand.vmem [shape: f32[2,16,3], index: 0, kind: input, shape index: {}]   ;;  %s4331_s1 = inlined_call_operand.vmem [shape: f32[2,16,2], index: 1, kind: input, shape index: {}]   ;;  %s4332_s2 = inlined_call_operand.vmem [shape: f32[3,3,8], index: 2, kind: input, shape index: {}]   ;;  %s4333_s3 = inlined_call_operand.vmem [shape: f32[1,8], index: 3, kind: input, shape index: {}]   ;;  %s4334_s4 = inlined_call_operand.vmem [shape: f32[3,8,8], index: 4, kind: input, shape index: {}]   ;;  %s4335_s5 = inlined_call_operand.vmem [shape: f32[1,8], index: 5, kind: input, shape index: {}]   ;;  %s4336_s6 = inlined_call_operand.vmem [shape: f32[3,2,8], index: 6, kind: input, shape index: {}]   ;;  %s4337_s7 = inlined_call_operand.vmem [shape: f32[1,8], index: 7, kind: input, shape index: {}]   ;;  %s4338_s8 = inlined_call_operand.vmem [shape: f32[3,8,8], index: 8, kind: input, shape index: {}]   ;;  %s4339_s9 = inlined_call_operand.vmem [shape: f32[1,8], index: 9, kind: input, shape index: {}]   ;;  %s4340_s10 = inlined_call_operand.vmem [shape: f32[3,2,16], index: 10, kind: input, shape index: {}]   ;;  %s4341_s11 = inlined_call_operand.vmem [shape: f32[1,16], index: 11, kind: input, shape index: {}]   ;;  %s4342_s12 = inlined_call_operand.vmem [shape: f32[3,16,32], index: 12, kind: input, shape index: {}]   ;;  %s4343_s13 = inlined_call_operand.vmem [shape: f32[1,32], index: 13, kind: input, shape index: {}]   ;;  %s4344_s14 = inlined_call_operand.hbm [shape: bf16[512,256], index: 14, kind: input, shape index: {}]   ;;  %s4345_s15 = inlined_call_operand.vmem [shape: f32[1,256], index: 15, kind: input, shape index: {}]   ;;  %s4346_s16 = inlined_call_operand.vmem [shape: f32[256,2], index: 16, kind: input, shape index: {}]   ;;  %s4347_s17 = inlined_call_operand.vmem [shape: f32[1,2], index: 17, kind: input, shape index: {}]   ;;  %s4348_s18 = inlined_call_operand.vmem [shape: f32[2,2], index: 18, kind: output, shape index: {}]  }
   0x1   :  { %4352 = sst [smem:[#allocation8_spill]] %s4330_s0 }
   0x2   :  { %4353 = sst [smem:[#allocation9_spill]] %s4331_s1 }
   0x3   :  { %4354 = sst [smem:[#allocation10_spill]] %s4332_s2 }
   0x4   :  { %23 = vsyncpa [#allocation6], 0  ;;  %s3674_s27 = smov [#allocation5]   ;;  %s3650_s0 = scalar_lea.hbm %s4344_s14, 8192 }
   0x5   :  { %s57_s28 = sshll.u32 %s3674_s27, 4  ;;  %p3651_p0 = scmp.ne.s32.totalorder %s4344_s14, %s3650_s0  ;;  %s58_s28 = int_to_ptr.vmem [resolvable:$true] %s57_s28 }
   0x6   :  { %p3654_p1 = scmp.lt.u32.totalorder %s3650_s0, %s4344_s14 }
   0x8   :  { %p3656_p2 = pnand %p3654_p1, %p3651_p0 }
   0xa   :  { %3659 = shalt.err (!%p3656_p2)
}
   0xb   :  { %s3660_s22 = scalar_lea.vmem %s58_s28, 8192  ;;  %p3665_p4 = scmp.lt.s32.totalorder %s58_s28, %s58_s28 }
   0xc   :  { %p3661_p3 = scmp.ne.s32.totalorder %s58_s28, %s3660_s22  ;;  %p3666_p5 = scmp.lt.s32.totalorder %s3660_s22, %s3660_s22 }
   0xe   :  { %p3667_p6 = por %p3666_p5, %p3665_p4 }
  0x10   :  { %p3668_p7 = pnand %p3667_p6, %p3661_p3 }
  0x12   :  { %3671 = shalt.err (!%p3668_p7)
}
  0x13   :  { %s3675_s2 = smov 128   ;;  %s3676_s23 = smov 8  }
  0x14   :  { %63 = dma.hbm_to_vmem [thread:$0]  %s4344_s14, 8192, %s58_s28, [#allocation6], %s3675_s2, %s3675_s2, %s3676_s23  }
  0x15   :  { %3672 = dma.done.wait [#allocation6], 8192  }
  0x16   :  { %3673 = vsyncadd [#allocation6], 4294959104  ;;  %vm79_vm0 = vcmask 17408   ;;  %v3677_v0 = vmov 0.0   ;;  %vm104_vm1 = vcmask 1042432   ;;  %vm82_vm2 = vcmask 23552  }
  0x17   :  { %80 = vst.msk [vmem:[#allocation2] sm:$0x3] %vm79_vm0, %v3677_v0  ;;  %81 = vst.msk [vmem:[#allocation2 + $0x18] sm:$0x3] %vm79_vm0, %v3677_v0  ;;  %s4355_s29 = sld [smem:[#allocation10_spill]]  ;;  %s4356_s19 = sld [smem:[#allocation8_spill]] }
  0x18   :  { %vm420_vm3 = vcmask 60416   ;;  %v432_v16 = vld [vmem:[%s4334_s4] sm:$0xff]  ;;  %v3032_v17 = vld [vmem:[%s4334_s4 + $0x8] sm:$0xff]  ;;  %v3023_v18 = vld [vmem:[%s4334_s4 + $0x10] sm:$0xff]  ;;  %vm423_vm4 = vcmask 64512   ;;  %vm772_vm5 = vcmask 9216  }
  0x19   :  { %3339 = vmatprep.subr.mxu1 %v3032_v17  ;;  %v3022_v19 = vld [vmem:[%s4333_s3] ss:$0 sm:$0xff]  ;;  %vm775_vm6 = vcmask 15360   ;;  %s4357_s28 = sld [smem:[#allocation9_spill]]  ;;  %vm797_vm7 = vcmask 1041408   ;;  %v3056_v56 = vld [vmem:[%s4338_s8 + $0x10] sm:$0xff] }
  0x1a   :  { %3340 = vmatpush3.msra.mxu1 %v3032_v17  ;;  %v784_v38 = vld [vmem:[%s4336_s6] sm:$0x3]  ;;  %v3038_v47 = vld [vmem:[%s4336_s6 + $0x4] sm:$0x3]  ;;  %v3049_v51 = vld [vmem:[%s4336_s6 + $0x2] sm:$0x3] }
  0x1b   :  { %v1123_v55 = vld [vmem:[%s4338_s8] sm:$0xff]  ;;  %vm761_vm8 = vcmask 7168   ;;  %vm1452_vm9 = vcmask 15368   ;;  %vm1802_vm10 = vcmask 125952   ;;  %vm1805_vm11 = vcmask 130048   ;;  %s3681_s20 = smov 64  }
  0x1c   :  { %3371 = vmatprep.subr.mxu1 %v1123_v55  ;;  %v3037_v62 = vld [vmem:[%s4335_s5] ss:$0 sm:$0xff]  ;;  %vm2154_vm12 = vcmask 1041409   ;;  %vm2156_vm13 = vcmask 1043459   ;;  %vm2158_vm14 = vcmask 1045509   ;;  %vm2160_vm15 = vcmask 1047559  }
  0x1d   :  { %v91_v1 = vld [vmem:[%s4355_s29] sm:$0x7]  ;;  %v3005_v3 = vld [vmem:[%s4355_s29 + $0x8] sm:$0x7]  ;;  %v75_v5 = vld [vmem:[%s4356_s19 + $0x10] sm:$0xff]  ;;  %vm2163_vm0 = vcmask 254976  }
  0x1e   :  { %v73_v2 = vld [vmem:[%s4356_s19] sm:$0xff]  ;;  %3299 = vmatprep.subr.msk.mxu0 %vm104_vm1, %v91_v1  ;;  %v74_v4 = vld [vmem:[%s4356_s19 + $0x8] sm:$0xff]  ;;  %v76_v6 = vld [vmem:[%s4356_s19 + $0x18] sm:$0xff]  ;;  %85 = vst.msk [vmem:[#allocation2 + $0x1a] sm:$0xff] %vm82_vm2, %v75_v5 }
  0x1f   :  { %83 = vst.msk [vmem:[#allocation2 + $0x2] sm:$0xff] %vm82_vm2, %v73_v2  ;;  %3300 = vmatpush3.msk.msra.mxu0 %vm104_vm1, %v91_v1  ;;  %84 = vst.msk [vmem:[#allocation2 + $0xa] sm:$0xff] %vm82_vm2, %v74_v4  ;;  %v3016_v10 = vld [vmem:[%s4355_s29 + $0x4] sm:$0x7]  ;;  %v767_v33 = vld [vmem:[%s4357_s28 + $0x8] sm:$0xff] }
  0x20   :  { %86 = vst.msk [vmem:[#allocation2 + $0x22] sm:$0xff] %vm82_vm2, %v76_v6  ;;  %3307 = vmatprep.subr.msk.mxu0 %vm104_vm1, %v3005_v3  ;;  %v766_v32 = vld [vmem:[%s4357_s28] sm:$0xff]  ;;  %v768_v39 = vld [vmem:[%s4357_s28 + $0x10] sm:$0xff]  ;;  %v769_v40 = vld [vmem:[%s4357_s28 + $0x18] sm:$0xff] }
  0x21   :  { %v3055_v17 = vld [vmem:[%s4337_s7] ss:$0 sm:$0xff]  ;;  %s3680_s7 = smov 96  }
  0x25   :  { %v89_v9 = vld [vmem:[#allocation2 + $0x18] sm:$0xff] }
  0x26   :  { %v87_v7 = vld [vmem:[#allocation2] sm:$0xff]  ;;  %v88_v8 = vld [vmem:[#allocation2 + $0x8] sm:$0xff] }
  0x27   :  { %3301 = vmatprep.mubr.msk.f32.mxu0 %vm82_vm2, %v87_v7  ;;  %v90_v11 = vld [vmem:[#allocation2 + $0x20] sm:$0xff]  ;;  %v294_v13 = vld [vmem:[#allocation2 + $0x9] sm:$0xff] }
  0x28   :  { %3302 = vmatmul.mubr.msk.f32.vlgmr.msra.gmra.mrb[0].mxu0 %vm82_vm2, %v88_v8  ;;  %v293_v12 = vld [vmem:[#allocation2 + $0x1] sm:$0xff]  ;;  %v295_v14 = vld [vmem:[#allocation2 + $0x19] sm:$0xff] }
  0x29   :  { %3308 = vmatpush3.msk.msra.mxu0 %vm104_vm1, %v3005_v3  ;;  %3304 = vmatprep.mubr.msk.f32.mxu0 %vm82_vm2, %v89_v9  ;;  %v296_v15 = vld [vmem:[#allocation2 + $0x21] sm:$0xff]  ;;  %421 = vst.msk [vmem:[#allocation2] sm:$0xf] %vm420_vm3, %v3677_v0  ;;  %422 = vst.msk [vmem:[#allocation2 + $0x18] sm:$0xf] %vm420_vm3, %v3677_v0 }
  0x2a   :  { %3315 = vmatprep.subr.msk.mxu0 %vm104_vm1, %v3016_v10 }
  0x2c   :  { %3305 = vmatmul.mubr.msk.f32.gmra.mrb[2].mxu0 %vm82_vm2, %v90_v11 }
  0x2d   :  { %3309 = vmatprep.mubr.msk.f32.mxu0 %vm82_vm2, %v73_v2 }
  0x30   :  { %3310 = vmatmul.mubr.msk.f32.vlgmr.msra.gmra.mrb[0].mxu0 %vm82_vm2, %v74_v4 }
  0x31   :  { %3316 = vmatpush3.msk.msra.mxu0 %vm104_vm1, %v3016_v10  ;;  %3312 = vmatprep.mubr.msk.f32.mxu0 %vm82_vm2, %v75_v5  ;;  %vm2175_vm1 = vcmask 517376  }
  0x32   :  { %3323 = vmatprep.subr.mxu0 %v432_v16 }
  0x34   :  { %3313 = vmatmul.mubr.msk.f32.gmra.mrb[2].mxu0 %vm82_vm2, %v76_v6 }
  0x35   :  { %3317 = vmatprep.mubr.msk.f32.mxu0 %vm82_vm2, %v293_v12 }
  0x38   :  { %3318 = vmatmul.mubr.msk.f32.vlgmr.msra.gmra.mrb[0].mxu0 %vm82_vm2, %v294_v13 }
  0x39   :  { %3320 = vmatprep.mubr.msk.f32.mxu0 %vm82_vm2, %v295_v14  ;;  %3324 = vmatpush3.msra.mxu0 %v432_v16 }
  0x3a   :  { %3331 = vmatprep.subr.mxu0 %v3023_v18 }
  0x3c   :  { %3321 = vmatmul.mubr.msk.f32.gmra.mrb[2].mxu0 %vm82_vm2, %v296_v15  ;;  %vm2189_vm2 = vcmask 779776  }
 0x10b   :  { %v3319_v20 = vpop.f32.mrb[0].mxu0 }
 0x10c   :  { %v411_v21 = vadd.f32 %v3319_v20, %v3022_v19  ;;  %v380_v22 = vpop.f32.mrb[1].mxu0 }
 0x10d   :  { %v410_v23 = vadd.f32 %v3022_v19, %v380_v22 }
 0x10e   :  { %v415_v24 = vmax.f32 %v411_v21, 0.0 }
 0x10f   :  { %v414_v25 = vmax.f32 %v410_v23, 0.0  ;;  %v3322_v26 = vpop.f32.mrb[2].mxu0 }
 0x110   :  { %425 = vst.msk [vmem:[#allocation2 + $0xc] sm:$0xff] %vm423_vm4, %v415_v24  ;;  %v413_v27 = vadd.f32 %v3322_v26, %v3022_v19  ;;  %v390_v28 = vpop.f32.mrb[3].mxu0 }
 0x111   :  { %424 = vst.msk [vmem:[#allocation2 + $0x4] sm:$0xff] %vm423_vm4, %v414_v25  ;;  %v412_v29 = vadd.f32 %v3022_v19, %v390_v28 }
 0x112   :  { %v417_v30 = vmax.f32 %v413_v27, 0.0 }
 0x113   :  { %v416_v31 = vmax.f32 %v412_v29, 0.0 }
 0x114   :  { %427 = vst.msk [vmem:[#allocation2 + $0x24] sm:$0xff] %vm423_vm4, %v417_v30 }
 0x115   :  { %426 = vst.msk [vmem:[#allocation2 + $0x1c] sm:$0xff] %vm423_vm4, %v416_v31 }
 0x118   :  { %v428_v34 = vld [vmem:[#allocation2] sm:$0xff]  ;;  %v429_v36 = vld [vmem:[#allocation2 + $0x8] sm:$0xff] }
 0x119   :  { %v627_v35 = vld [vmem:[#allocation2 + $0x2] sm:$0xff]  ;;  %3325 = vmatprep.mubr.msk.f32.mxu0 %vm423_vm4, %v428_v34  ;;  %773 = vst.msk [vmem:[#allocation2] sm:$0x3] %vm772_vm5, %v3677_v0  ;;  %v628_v37 = vld [vmem:[#allocation2 + $0xa] sm:$0xff] }
 0x11a   :  { %3341 = vmatprep.mubr.msk.f32.mxu1 %vm423_vm4, %v627_v35  ;;  %776 = vst.msk [vmem:[#allocation2 + $0x2] sm:$0xff] %vm775_vm6, %v766_v32  ;;  %3326 = vmatmul.mubr.msk.f32.vlgmr.msra.gmra.mrb[4].mxu0 %vm423_vm4, %v429_v36  ;;  %777 = vst.msk [vmem:[#allocation2 + $0xa] sm:$0xff] %vm775_vm6, %v767_v33 }
 0x11b   :  { %3342 = vmatmul.mubr.msk.f32.vlgmr.msra.gmra.mrb[0].mxu1 %vm423_vm4, %v628_v37  ;;  %3332 = vmatpush3.msra.mxu0 %v3023_v18 }
 0x11c   :  { %v430_v41 = vld [vmem:[#allocation2 + $0x18] sm:$0xff]  ;;  %v431_v43 = vld [vmem:[#allocation2 + $0x20] sm:$0xff]  ;;  %3347 = vmatprep.subr.msk.mxu0 %vm797_vm7, %v784_v38  ;;  %3372 = vmatpush3.msra.mxu1 %v1123_v55 }
 0x11d   :  { %v629_v42 = vld [vmem:[#allocation2 + $0x1a] sm:$0xff]  ;;  %3328 = vmatprep.mubr.msk.f32.mxu0 %vm423_vm4, %v430_v41  ;;  %774 = vst.msk [vmem:[#allocation2 + $0x18] sm:$0x3] %vm772_vm5, %v3677_v0  ;;  %v630_v44 = vld [vmem:[#allocation2 + $0x22] sm:$0xff]  ;;  %3379 = vmatprep.subr.mxu1 %v3056_v56 }
 0x11e   :  { %3344 = vmatprep.mubr.msk.f32.mxu1 %vm423_vm4, %v629_v42  ;;  %778 = vst.msk [vmem:[#allocation2 + $0x1a] sm:$0xff] %vm775_vm6, %v768_v39  ;;  %3329 = vmatmul.mubr.msk.f32.gmra.mrb[6].mxu0 %vm423_vm4, %v431_v43  ;;  %779 = vst.msk [vmem:[#allocation2 + $0x22] sm:$0xff] %vm775_vm6, %v769_v40  ;;  %v3070_v42 = vld [vmem:[%s4339_s9] ss:$0 sm:$0xff] }
 0x11f   :  { %3345 = vmatmul.mubr.msk.f32.gmra.mrb[2].mxu1 %vm423_vm4, %v630_v44  ;;  %3333 = vmatprep.mubr.msk.f32.mxu0 %vm423_vm4, %v414_v25 }
 0x121   :  { %v780_v45 = vld [vmem:[#allocation2] sm:$0xff]  ;;  %v781_v50 = vld [vmem:[#allocation2 + $0x8] sm:$0xff] }
 0x122   :  { %v986_v46 = vld [vmem:[#allocation2 + $0x1] sm:$0xff]  ;;  %3334 = vmatmul.mubr.msk.f32.vlgmr.msra.gmra.mrb[4].mxu0 %vm423_vm4, %v415_v24  ;;  %v987_v53 = vld [vmem:[#allocation2 + $0x9] sm:$0xff] }
 0x123   :  { %1113 = vst.msk [vmem:[#allocation2] sm:$0xf] %vm420_vm3, %v3677_v0  ;;  %3348 = vmatpush3.msk.msra.mxu0 %vm797_vm7, %v784_v38  ;;  %3336 = vmatprep.mubr.msk.f32.mxu0 %vm423_vm4, %v416_v31 }
 0x124   :  { %3355 = vmatprep.subr.msk.mxu0 %vm797_vm7, %v3038_v47 }
 0x125   :  { %v782_v48 = vld [vmem:[#allocation2 + $0x18] sm:$0xff]  ;;  %v783_v52 = vld [vmem:[#allocation2 + $0x20] sm:$0xff] }
 0x126   :  { %v988_v49 = vld [vmem:[#allocation2 + $0x19] sm:$0xff]  ;;  %3337 = vmatmul.mubr.msk.f32.gmra.mrb[6].mxu0 %vm423_vm4, %v417_v30  ;;  %v989_v54 = vld [vmem:[#allocation2 + $0x21] sm:$0xff] }
 0x127   :  { %1114 = vst.msk [vmem:[#allocation2 + $0x18] sm:$0xf] %vm420_vm3, %v3677_v0  ;;  %3349 = vmatprep.mubr.msk.f32.mxu0 %vm775_vm6, %v780_v45  ;;  %vm2201_vm3 = vcmask 1042176  }
 0x12a   :  { %3350 = vmatmul.mubr.msk.f32.vlgmr.msra.gmra.mrb[8].mxu0 %vm775_vm6, %v781_v50 }
 0x12b   :  { %3356 = vmatpush3.msk.msra.mxu0 %vm797_vm7, %v3038_v47  ;;  %3352 = vmatprep.mubr.msk.f32.mxu0 %vm775_vm6, %v782_v48 }
 0x12c   :  { %3363 = vmatprep.subr.msk.mxu0 %vm797_vm7, %v3049_v51 }
 0x12e   :  { %3353 = vmatmul.mubr.msk.f32.gmra.mrb[10].mxu0 %vm775_vm6, %v783_v52 }
 0x12f   :  { %3357 = vmatprep.mubr.msk.f32.mxu0 %vm775_vm6, %v766_v32  ;;  %v3065_v32 = vld [vmem:[%s4338_s8 + $0x8] sm:$0xff] }
 0x132   :  { %3358 = vmatmul.mubr.msk.f32.vlgmr.msra.gmra.mrb[8].mxu0 %vm775_vm6, %v767_v33 }
 0x133   :  { %3364 = vmatpush3.msk.msra.mxu0 %vm797_vm7, %v3049_v51  ;;  %3360 = vmatprep.mubr.msk.f32.mxu0 %vm775_vm6, %v768_v39 }
 0x136   :  { %3361 = vmatmul.mubr.msk.f32.gmra.mrb[10].mxu0 %vm775_vm6, %v769_v40 }
 0x137   :  { %3365 = vmatprep.mubr.msk.f32.mxu0 %vm775_vm6, %v986_v46 }
 0x13a   :  { %3366 = vmatmul.mubr.msk.f32.vlgmr.msra.gmra.mrb[8].mxu0 %vm775_vm6, %v987_v53 }
 0x13b   :  { %3368 = vmatprep.mubr.msk.f32.mxu0 %vm775_vm6, %v988_v49 }
 0x13e   :  { %3369 = vmatmul.mubr.msk.f32.gmra.mrb[10].mxu0 %vm775_vm6, %v989_v54 }
 0x1ee   :  { %v3343_v57 = vpop.f32.mrb[0].mxu1 }
 0x1ef   :  { %v711_v58 = vpop.f32.mrb[1].mxu1 }
 0x1f2   :  { %v3346_v59 = vpop.f32.mrb[2].mxu1 }
 0x1f3   :  { %v721_v60 = vpop.f32.mrb[3].mxu1 }
 0x1f5   :  { %v3335_v61 = vpop.f32.mrb[4].mxu0 }
 0x1f6   :  { %v3493_v63 = vadd.f32 %v3343_v57, %v3335_v61  ;;  %v608_v1 = vpop.f32.mrb[5].mxu0  ;;  %v1473_v61 = vld [vmem:[%s4340_s10] sm:$0x3] }
 0x1f7   :  { %v3494_v2 = vadd.f32 %v711_v58, %v608_v1  ;;  %3395 = vmatprep.subr.msk.mxu0 %vm797_vm7, %v1473_v61 }
 0x1f8   :  { %v742_v3 = vadd.f32 %v3493_v63, %v3037_v62  ;;  %3396 = vmatpush3.msk.msra.mxu0 %vm797_vm7, %v1473_v61  ;;  %v3571_v61 = vld [vmem:[#allocation5 + $0x30] ss:$8 sps:$4 sm:$0xff]  }
 0x1f9   :  { %v741_v4 = vadd.f32 %v3494_v2, %v3037_v62  ;;  %v3338_v5 = vpop.f32.mrb[6].mxu0 }
 0x1fa   :  { %v3495_v6 = vadd.f32 %v3346_v59, %v3338_v5  ;;  %v618_v7 = vpop.f32.mrb[7].mxu0  ;;  %v746_v8 = vmax.f32 %v742_v3, 0.0 }
 0x1fb   :  { %v3496_v9 = vadd.f32 %v721_v60, %v618_v7  ;;  %v745_v12 = vmax.f32 %v741_v4, 0.0 }
 0x1fc   :  { %v3926_v10 = vadd.f32 %v3495_v6, %v3037_v62  ;;  %v752_v11 = vsel %vm423_vm4, %v746_v8, -inf }
 0x1fd   :  { %v743_v13 = vadd.f32 %v3496_v9, %v3037_v62  ;;  %753 = vmax.xlane.f32.xlu0 %v752_v11  ;;  %v749_v14 = vsel %vm423_vm4, %v745_v12, -inf  ;;  %v3071_v62 = vld [vmem:[%s4340_s10 + $0x4] sm:$0x3]  ;;  %v3082_v12 = vld [vmem:[%s4340_s10 + $0x2] sm:$0x3] }
 0x1fe   :  { %3403 = vmatprep.subr.msk.mxu0 %vm797_vm7, %v3071_v62 }
 0x1ff   :  { %v747_v15 = vmax.f32 %v743_v13, 0.0 }
 0x201   :  { %750 = vmax.xlane.f32.xlu0 %v749_v14  ;;  %v755_v16 = vsel %vm423_vm4, %v747_v15, -inf }
 0x205   :  { %756 = vmax.xlane.f32.xlu0 %v755_v16 }
 0x20d   :  { %v3367_v18 = vpop.f32.mrb[8].mxu0 }
 0x20e   :  { %v1104_v19 = vadd.f32 %v3367_v18, %v3055_v17  ;;  %v1073_v20 = vpop.f32.mrb[9].mxu0  ;;  %v1814_v18 = vld [vmem:[%s4342_s12] sm:$0xff] }
 0x20f   :  { %v1103_v21 = vadd.f32 %v3055_v17, %v1073_v20 }
 0x210   :  { %v1108_v22 = vmax.f32 %v1104_v19, 0.0  ;;  %v1815_v19 = vld [vmem:[%s4342_s12 + $0x8] sm:$0xff] }
 0x211   :  { %v1107_v23 = vmax.f32 %v1103_v21, 0.0  ;;  %v3370_v24 = vpop.f32.mrb[10].mxu0  ;;  %v3449_v20 = vpack.c.bf16 %v1815_v19, %v1814_v18  ;;  %v3089_v21 = vld [vmem:[%s4342_s12 + $0x20] sm:$0xff] }
 0x212   :  { %1116 = vst.msk [vmem:[#allocation2 + $0xc] sm:$0xff] %vm423_vm4, %v1108_v22  ;;  %v1106_v25 = vadd.f32 %v3370_v24, %v3055_v17  ;;  %v1083_v26 = vpop.f32.mrb[11].mxu0 }
 0x213   :  { %1115 = vst.msk [vmem:[#allocation2 + $0x4] sm:$0xff] %vm423_vm4, %v1107_v23  ;;  %v1105_v27 = vadd.f32 %v3055_v17, %v1083_v26 }
 0x214   :  { %v1110_v28 = vmax.f32 %v1106_v25, 0.0 }
 0x215   :  { %v1109_v29 = vmax.f32 %v1105_v27, 0.0 }
 0x216   :  { %1118 = vst.msk [vmem:[#allocation2 + $0x24] sm:$0xff] %vm423_vm4, %v1110_v28 }
 0x217   :  { %1117 = vst.msk [vmem:[#allocation2 + $0x1c] sm:$0xff] %vm423_vm4, %v1109_v29 }
 0x21a   :  { %v1119_v30 = vld [vmem:[#allocation2] sm:$0xff]  ;;  %v1120_v31 = vld [vmem:[#allocation2 + $0x8] sm:$0xff] }
 0x21b   :  { %3373 = vmatprep.mubr.msk.f32.mxu1 %vm423_vm4, %v1119_v30  ;;  %1463 = vst.msk [vmem:[#allocation2] sm:$0x3] %vm772_vm5, %v3677_v0  ;;  %v1318_v35 = vld [vmem:[#allocation2 + $0x2] sm:$0xff]  ;;  %v1319_v36 = vld [vmem:[#allocation2 + $0xa] sm:$0xff] }
 0x21c   :  { %3374 = vmatmul.mubr.msk.f32.vlgmr.msra.gmra.mrb[4].mxu1 %vm423_vm4, %v1120_v31 }
 0x21d   :  { %3380 = vmatpush3.msra.mxu1 %v3056_v56  ;;  %v748_v56 = vmax.f32 %v3926_v10, 0.0 }
 0x21e   :  { %v1121_v33 = vld [vmem:[#allocation2 + $0x18] sm:$0xff]  ;;  %v1122_v34 = vld [vmem:[#allocation2 + $0x20] sm:$0xff]  ;;  %3387 = vmatprep.subr.mxu1 %v3065_v32 }
 0x21f   :  { %3376 = vmatprep.mubr.msk.f32.mxu1 %vm423_vm4, %v1121_v33  ;;  %1464 = vst.msk [vmem:[#allocation2 + $0x18] sm:$0x3] %vm772_vm5, %v3677_v0  ;;  %v1320_v37 = vld [vmem:[#allocation2 + $0x1a] sm:$0xff]  ;;  %v1321_v38 = vld [vmem:[#allocation2 + $0x22] sm:$0xff]  ;;  %v758_v59 = vsel %vm423_vm4, %v748_v56, -inf }
 0x220   :  { %3377 = vmatmul.mubr.msk.f32.gmra.mrb[6].mxu1 %vm423_vm4, %v1122_v34  ;;  %v3570_v56 = vld [vmem:[#allocation5 + $0x124] ss:$8 sps:$4 sm:$0xff]  }
 0x221   :  { %3381 = vmatprep.mubr.msk.f32.mxu1 %vm423_vm4, %v1107_v23  ;;  %v3088_v23 = vld [vmem:[%s4341_s11] ss:$0 sm:$0xff] }
 0x224   :  { %3382 = vmatmul.mubr.msk.f32.vlgmr.msra.gmra.mrb[4].mxu1 %vm423_vm4, %v1108_v22  ;;  %v3090_v22 = vld [vmem:[%s4342_s12 + $0x28] sm:$0xff] }
 0x225   :  { %3388 = vmatpush3.msra.mxu1 %v3065_v32  ;;  %3384 = vmatprep.mubr.msk.f32.mxu1 %vm423_vm4, %v1109_v29 }
 0x226   :  { %3450 = vmatprep.subr.bf16.mxu1 %v3449_v20 }
 0x228   :  { %3385 = vmatmul.mubr.msk.f32.gmra.mrb[6].mxu1 %vm423_vm4, %v1110_v28 }
 0x229   :  { %3389 = vmatprep.mubr.msk.f32.mxu1 %vm423_vm4, %v1318_v35 }
 0x22c   :  { %3390 = vmatmul.mubr.msk.f32.vlgmr.msra.gmra.mrb[4].mxu1 %vm423_vm4, %v1319_v36  ;;  %v3099_v36 = vld [vmem:[%s4342_s12 + $0x10] sm:$0xff] }
 0x22d   :  { %3392 = vmatprep.mubr.msk.f32.mxu1 %vm423_vm4, %v1320_v37  ;;  %3452 = vmatpush3.bf16.msra.mxu1 %v3449_v20  ;;  %v3100_v37 = vld [vmem:[%s4342_s12 + $0x18] sm:$0xff] }
 0x230   :  { %3393 = vmatmul.mubr.msk.f32.gmra.mrb[6].mxu1 %vm423_vm4, %v1321_v38 }
 0x28a   :  { %v754_v39 = vpop.xlane.xlu0 %753 }
 0x28b   :  { %763 = vst.msk [vmem:[#allocation3 + $0x8] sm:$0xff] %vm761_vm8, %v754_v39 }
 0x28e   :  { %v751_v40 = vpop.xlane.xlu0 %750 }
 0x28f   :  { %762 = vst.msk [vmem:[#allocation3] sm:$0xff] %vm761_vm8, %v751_v40  ;;  %v3457_v40 = vpack.c.bf16 %v3100_v37, %v3099_v36 }
 0x292   :  { %v757_v41 = vpop.xlane.xlu0 %756 }
 0x293   :  { %764 = vst.msk [vmem:[#allocation3 + $0x10] sm:$0xff] %vm761_vm8, %v757_v41 }
 0x2ff   :  { %v3391_v43 = vpop.f32.mrb[4].mxu1 }
 0x300   :  { %v1433_v44 = vadd.f32 %v3391_v43, %v3070_v42  ;;  %v1402_v45 = vpop.f32.mrb[5].mxu1 }
 0x301   :  { %v1432_v46 = vadd.f32 %v3070_v42, %v1402_v45 }
 0x302   :  { %v1437_v47 = vmax.f32 %v1433_v44, 0.0 }
 0x303   :  { %v3394_v48 = vpop.f32.mrb[6].mxu1  ;;  %v1436_v49 = vmax.f32 %v1432_v46, 0.0 }
 0x304   :  { %v1412_v50 = vpop.f32.mrb[7].mxu1  ;;  %v1443_v51 = vsel %vm423_vm4, %v1437_v47, -inf  ;;  %v1435_v54 = vadd.f32 %v3394_v48, %v3070_v42  ;;  %v3553_v47 = vld [vmem:[#allocation5] ss:$8 sps:$4 sm:$0xff]   ;;  %v3555_v48 = vld [vmem:[#allocation5 + $0x4] ss:$8 sps:$4 sm:$0xff]  }
 0x305   :  { %v1434_v52 = vadd.f32 %v3070_v42, %v1412_v50  ;;  %1444 = vmax.xlane.f32.xlu1 %v1443_v51  ;;  %v1440_v55 = vsel %vm423_vm4, %v1436_v49, -inf  ;;  %v3556_v49 = vld [vmem:[#allocation5 + $0x100] ss:$8 sps:$4 sm:$0xff]   ;;  %v3558_v50 = vld [vmem:[#allocation5 + $0x104] ss:$8 sps:$4 sm:$0xff]  }
 0x306   :  { %v1439_v58 = vmax.f32 %v1435_v54, 0.0  ;;  %v3561_v51 = vld [vmem:[#allocation5 + $0x14] ss:$8 sps:$4 sm:$0xff]   ;;  %v3562_v54 = vld [vmem:[#allocation5 + $0x110] ss:$8 sps:$4 sm:$0xff]  }
 0x307   :  { %v1438_v53 = vmax.f32 %v1434_v52, 0.0  ;;  %v3564_v52 = vld [vmem:[#allocation5 + $0x114] ss:$8 sps:$4 sm:$0xff]  }
 0x308   :  { %v1449_v60 = vsel %vm423_vm4, %v1439_v58, -inf  ;;  %v3568_v58 = vld [vmem:[#allocation5 + $0x120] ss:$8 sps:$4 sm:$0xff]  }
 0x309   :  { %1441 = vmax.xlane.f32.xlu1 %v1440_v55  ;;  %v1446_v57 = vsel %vm423_vm4, %v1438_v53, -inf  ;;  %v3559_v53 = vld [vmem:[#allocation5 + $0x10] ss:$8 sps:$4 sm:$0xff]   ;;  %v3567_v55 = vld [vmem:[#allocation5 + $0x24] ss:$8 sps:$4 sm:$0xff]  }
 0x30a   :  { %1447 = vmax.xlane.f32.xlu0 %v1446_v57  ;;  %v3565_v57 = vld [vmem:[#allocation5 + $0x20] ss:$8 sps:$4 sm:$0xff]  }
 0x30d   :  { %759 = vmax.xlane.f32.xlu1 %v758_v59  ;;  %v3573_v59 = vld [vmem:[#allocation5 + $0x34] ss:$8 sps:$4 sm:$0xff]  }
 0x311   :  { %1450 = vmax.xlane.f32.xlu1 %v1449_v60  ;;  %v3576_v60 = vld [vmem:[#allocation5 + $0x134] ss:$8 sps:$4 sm:$0xff]  }
 0x392   :  { %v1445_v63 = vpop.xlane.xlu1 %1444 }
 0x393   :  { %1454 = vst.msk [vmem:[#allocation3 + $0x8] sm:$0xff] %vm1452_vm9, %v1445_v63  ;;  %v3579_v63 = vld [vmem:[#allocation5 + $0x44] ss:$8 sps:$4 sm:$0xff]  }
 0x396   :  { %v1442_v1 = vpop.xlane.xlu1 %1441 }
 0x397   :  { %1453 = vst.msk [vmem:[#allocation3] sm:$0xff] %vm1452_vm9, %v1442_v1  ;;  %v1448_v2 = vpop.xlane.xlu0 %1447  ;;  %v3582_v1 = vld [vmem:[#allocation5 + $0x144] ss:$8 sps:$4 sm:$0xff]  }
 0x398   :  { %1455 = vst.msk [vmem:[#allocation3 + $0x10] sm:$0xff] %vm1452_vm9, %v1448_v2  ;;  %v3577_v2 = vld [vmem:[#allocation5 + $0x40] ss:$8 sps:$4 sm:$0xff]  }
 0x39a   :  { %v1458_v3 = vld [vmem:[#allocation3 + $0x8] sm:$0xff]  ;;  %v760_v4 = vpop.xlane.xlu1 %759 }
 0x39b   :  { %1466 = vst.msk [vmem:[#allocation2 + $0xa] sm:$0xff] %vm775_vm6, %v1458_v3 }
 0x39c   :  { %765 = vst.msk [vmem:[#allocation3 + $0x18] sm:$0xff] %vm761_vm8, %v760_v4  ;;  %v3585_v4 = vld [vmem:[#allocation5 + $0x54] ss:$8 sps:$4 sm:$0xff]  }
 0x39e   :  { %v1457_v5 = vld [vmem:[#allocation3] sm:$0xff]  ;;  %v1451_v6 = vpop.xlane.xlu1 %1450 }
 0x39f   :  { %1465 = vst.msk [vmem:[#allocation2 + $0x2] sm:$0xff] %vm775_vm6, %v1457_v5  ;;  %v1459_v7 = vld [vmem:[#allocation3 + $0x10] sm:$0xff] }
 0x3a0   :  { %1456 = vst.msk [vmem:[#allocation3 + $0x18] sm:$0xff] %vm1452_vm9, %v1451_v6  ;;  %v3583_v6 = vld [vmem:[#allocation5 + $0x50] ss:$8 sps:$4 sm:$0xff]  }
 0x3a1   :  { %1467 = vst.msk [vmem:[#allocation2 + $0x1a] sm:$0xff] %vm775_vm6, %v1459_v7 }
 0x3a6   :  { %v1469_v9 = vld [vmem:[#allocation2] sm:$0xff]  ;;  %v1470_v10 = vld [vmem:[#allocation2 + $0x8] sm:$0xff] }
 0x3a7   :  { %v1460_v8 = vld [vmem:[#allocation3 + $0x18] sm:$0xff]  ;;  %3397 = vmatprep.mubr.msk.f32.mxu0 %vm775_vm6, %v1469_v9  ;;  %v3589_v9 = vld [vmem:[#allocation5 + $0x60] ss:$8 sps:$4 sm:$0xff]  }
 0x3a8   :  { %1468 = vst.msk [vmem:[#allocation2 + $0x22] sm:$0xff] %vm775_vm6, %v1460_v8  ;;  %v1471_v11 = vld [vmem:[#allocation2 + $0x18] sm:$0xff]  ;;  %3398 = vmatmul.mubr.msk.f32.vlgmr.msra.gmra.mrb[12].mxu0 %vm775_vm6, %v1470_v10  ;;  %v1674_v14 = vld [vmem:[#allocation2 + $0x1] sm:$0xff]  ;;  %v1675_v15 = vld [vmem:[#allocation2 + $0x9] sm:$0xff]  ;;  %v3678_v10 = vmov 1983009808  }
 0x3a9   :  { %3400 = vmatprep.mubr.msk.f32.mxu0 %vm775_vm6, %v1471_v11  ;;  %3404 = vmatpush3.msk.msra.mxu0 %vm797_vm7, %v3071_v62  ;;  %v1676_v16 = vld [vmem:[#allocation2 + $0x19] sm:$0xff]  ;;  %1803 = vst.msk [vmem:[#allocation2] sm:$0xf] %vm1802_vm10, %v3677_v0  ;;  %v3574_v62 = vld [vmem:[#allocation5 + $0x130] ss:$8 sps:$4 sm:$0xff]   ;;  %v2136_v11 = vunpack.c.l.s4 %v3678_v10 }
 0x3aa   :  { %3411 = vmatprep.subr.msk.mxu0 %vm797_vm7, %v3082_v12  ;;  %1804 = vst.msk [vmem:[#allocation2 + $0x18] sm:$0xf] %vm1802_vm10, %v3677_v0  ;;  %v3453_v0 = vpack.c.bf16 %v3090_v22, %v3089_v21 }
 0x3ac   :  { %3454 = vmatprep.subr.bf16.mxu1 %v3453_v0 }
 0x3af   :  { %v1472_v13 = vld [vmem:[#allocation2 + $0x20] sm:$0xff] }
 0x3b0   :  { %3401 = vmatmul.mubr.msk.f32.gmra.mrb[14].mxu0 %vm775_vm6, %v1472_v13  ;;  %v1677_v17 = vld [vmem:[#allocation2 + $0x21] sm:$0xff]  ;;  %v2137_v13 = vunpack.c.0.s8 %v2136_v11 }
 0x3b1   :  { %3405 = vmatprep.mubr.msk.f32.mxu0 %vm775_vm6, %v1457_v5  ;;  %v3588_v5 = vld [vmem:[#allocation5 + $0x154] ss:$8 sps:$4 sm:$0xff]  }
 0x3b4   :  { %3406 = vmatmul.mubr.msk.f32.vlgmr.msra.gmra.mrb[12].mxu0 %vm775_vm6, %v1458_v3  ;;  %v3580_v3 = vld [vmem:[#allocation5 + $0x140] ss:$8 sps:$4 sm:$0xff]  }
 0x3b5   :  { %3412 = vmatpush3.msk.msra.mxu0 %vm797_vm7, %v3082_v12  ;;  %3408 = vmatprep.mubr.msk.f32.mxu0 %vm775_vm6, %v1459_v7  ;;  %v3586_v7 = vld [vmem:[#allocation5 + $0x150] ss:$8 sps:$4 sm:$0xff]   ;;  %v2138_v12 = vlaneseq }
 0x3b6   :  { %2847 = vmatprep.subr.bf16.mxu0 %v3558_v50 }
 0x3b8   :  { %3409 = vmatmul.mubr.msk.f32.gmra.mrb[14].mxu0 %vm775_vm6, %v1460_v8  ;;  %v3591_v8 = vld [vmem:[#allocation5 + $0x64] ss:$8 sps:$4 sm:$0xff]  }
 0x3b9   :  { %3413 = vmatprep.mubr.msk.f32.mxu0 %vm775_vm6, %v1674_v14  ;;  %v4040_v14 = vshrl.u32 %v2138_v12, 7 }
 0x3bb   :  { %v4046_v18 = vsub.s32 %v2137_v13, %v4040_v14 }
 0x3bc   :  { %3414 = vmatmul.mubr.msk.f32.vlgmr.msra.gmra.mrb[12].mxu0 %vm775_vm6, %v1675_v15  ;;  %v3105_v15 = vld [vmem:[%s4343_s13] ss:$0 sm:$0xff]  ;;  %s3679_s13 = smov 32  }
 0x3bd   :  { %3416 = vmatprep.mubr.msk.f32.mxu0 %vm775_vm6, %v1676_v16  ;;  %2848 = vmatpush1.bf16.msra.mxu0 %v3556_v49 }
 0x3be   :  { %2849 = vmatprep.subr.bf16.mxu0 %v3564_v52 }
 0x3c0   :  { %3417 = vmatmul.mubr.msk.f32.gmra.mrb[14].mxu0 %vm775_vm6, %v1677_v17 }
 0x3c1   :  { %2850 = vmatpush1.bf16.msra.mxu0 %v3562_v54 }
 0x3c2   :  { %2851 = vmatprep.subr.bf16.mxu0 %v3570_v56 }
 0x3c5   :  { %2852 = vmatpush1.bf16.msra.mxu0 %v3568_v58 }
 0x3c6   :  { %2853 = vmatprep.subr.bf16.mxu0 %v3576_v60 }
 0x3c9   :  { %2854 = vmatpush1.bf16.msra.mxu0 %v3574_v62  ;;  %v3604_v62 = vld [vmem:[#allocation5 + $0x180] ss:$8 sps:$4 sm:$0xff]  }
 0x3ca   :  { %2855 = vmatprep.subr.bf16.mxu0 %v3582_v1 }
 0x3cd   :  { %2856 = vmatpush1.bf16.msra.mxu0 %v3580_v3 }
 0x3ce   :  { %2857 = vmatprep.subr.bf16.mxu0 %v3588_v5 }
 0x3d1   :  { %2858 = vmatpush1.bf16.msra.mxu0 %v3586_v7 }
 0x48f   :  { %v3415_v24 = vpop.f32.mrb[12].mxu0 }
 0x490   :  { %v1792_v25 = vadd.f32 %v3415_v24, %v3088_v23  ;;  %v1761_v26 = vpop.f32.mrb[13].mxu0  ;;  %v3594_v24 = vld [vmem:[#allocation5 + $0x164] ss:$8 sps:$4 sm:$0xff]  }
 0x491   :  { %v1791_v27 = vadd.f32 %v3088_v23, %v1761_v26  ;;  %2859 = vmatprep.subr.bf16.mxu0 %v3594_v24  ;;  %v3610_v24 = vld [vmem:[#allocation5 + $0x190] ss:$8 sps:$4 sm:$0xff]  }
 0x492   :  { %v1796_v28 = vmax.f32 %v1792_v25, 0.0 }
 0x493   :  { %v1795_v29 = vmax.f32 %v1791_v27, 0.0  ;;  %v3418_v30 = vpop.f32.mrb[14].mxu0 }
 0x494   :  { %v1794_v31 = vadd.f32 %v3418_v30, %v3088_v23  ;;  %v1771_v32 = vpop.f32.mrb[15].mxu0  ;;  %1807 = vst.msk [vmem:[#allocation2 + $0xc] sm:$0xff] %vm1805_vm11, %v1796_v28  ;;  %v3597_v30 = vld [vmem:[#allocation5 + $0x74] ss:$8 sps:$4 sm:$0xff]  }
 0x495   :  { %v1793_v33 = vadd.f32 %v3088_v23, %v1771_v32  ;;  %1806 = vst.msk [vmem:[#allocation2 + $0x4] sm:$0xff] %vm1805_vm11, %v1795_v29  ;;  %v3592_v23 = vld [vmem:[#allocation5 + $0x160] ss:$8 sps:$4 sm:$0xff]  }
 0x496   :  { %v1798_v34 = vmax.f32 %v1794_v31, 0.0  ;;  %2860 = vmatpush1.bf16.msra.mxu0 %v3592_v23 }
 0x497   :  { %v1797_v35 = vmax.f32 %v1793_v33, 0.0 }
 0x498   :  { %1809 = vst.msk [vmem:[#allocation2 + $0x24] sm:$0xff] %vm1805_vm11, %v1798_v34 }
 0x499   :  { %1808 = vst.msk [vmem:[#allocation2 + $0x1c] sm:$0xff] %vm1805_vm11, %v1797_v35 }
 0x49c   :  { %v1810_v38 = vld [vmem:[#allocation2] sm:$0xff]  ;;  %v1811_v39 = vld [vmem:[#allocation2 + $0x8] sm:$0xff] }
 0x49d   :  { %3423 = vmatprep.mubr.msk.f32.mxu1 %vm1805_vm11, %v1810_v38  ;;  %v2010_v43 = vld [vmem:[#allocation2 + $0x2] sm:$0xff]  ;;  %v2011_v44 = vld [vmem:[#allocation2 + $0xa] sm:$0xff] }
 0x49e   :  { %3424 = vmatmul.mubr.msk.f32.vlgmr.msra.gmra.mrb[8].mxu1 %vm1805_vm11, %v1811_v39  ;;  %v3598_v38 = vld [vmem:[#allocation5 + $0x170] ss:$8 sps:$4 sm:$0xff]   ;;  %v3600_v39 = vld [vmem:[#allocation5 + $0x174] ss:$8 sps:$4 sm:$0xff]  }
 0x49f   :  { %3456 = vmatpush3.bf16.msra.mxu1 %v3453_v0  ;;  %2861 = vmatprep.subr.bf16.mxu0 %v3600_v39  ;;  %v3613_v39 = vld [vmem:[#allocation5 + $0xa0] ss:$8 sps:$4 sm:$0xff]  }
 0x4a0   :  { %v1812_v41 = vld [vmem:[#allocation2 + $0x18] sm:$0xff]  ;;  %v1813_v42 = vld [vmem:[#allocation2 + $0x20] sm:$0xff]  ;;  %3458 = vmatprep.subr.bf16.mxu1 %v3457_v40  ;;  %2862 = vmatpush1.bf16.msra.mxu0 %v3598_v38 }
 0x4a1   :  { %3426 = vmatprep.mubr.msk.f32.mxu1 %vm1805_vm11, %v1812_v41  ;;  %v2012_v45 = vld [vmem:[#allocation2 + $0x1a] sm:$0xff]  ;;  %v2013_v46 = vld [vmem:[#allocation2 + $0x22] sm:$0xff] }
 0x4a2   :  { %3427 = vmatmul.mubr.msk.f32.gmra.mrb[10].mxu1 %vm1805_vm11, %v1813_v42 }
 0x4a3   :  { %3433 = vmatprep.mubr.msk.f32.mxu1 %vm1805_vm11, %v1795_v29  ;;  %v3595_v29 = vld [vmem:[#allocation5 + $0x70] ss:$8 sps:$4 sm:$0xff]  }
 0x4a6   :  { %3434 = vmatmul.mubr.msk.f32.vlgmr.msra.gmra.mrb[8].mxu1 %vm1805_vm11, %v1796_v28 }
 0x4a7   :  { %3460 = vmatpush3.bf16.msra.mxu1 %v3457_v40  ;;  %3436 = vmatprep.mubr.msk.f32.mxu1 %vm1805_vm11, %v1797_v35 }
 0x4a8   :  { %2806 = vmatprep.subr.bf16.mxu1 %v3555_v48 }
 0x4aa   :  { %3437 = vmatmul.mubr.msk.f32.gmra.mrb[10].mxu1 %vm1805_vm11, %v1798_v34 }
 0x4ab   :  { %3443 = vmatprep.mubr.msk.f32.mxu1 %vm1805_vm11, %v2010_v43 }
 0x4ae   :  { %3444 = vmatmul.mubr.msk.f32.vlgmr.msra.gmra.mrb[8].mxu1 %vm1805_vm11, %v2011_v44  ;;  %v3601_v44 = vld [vmem:[#allocation5 + $0x80] ss:$8 sps:$4 sm:$0xff]  }
 0x4af   :  { %3446 = vmatprep.mubr.msk.f32.mxu1 %vm1805_vm11, %v2012_v45  ;;  %2807 = vmatpush1.bf16.msra.mxu1 %v3553_v47  ;;  %v3603_v45 = vld [vmem:[#allocation5 + $0x84] ss:$8 sps:$4 sm:$0xff]  }
 0x4b0   :  { %2808 = vmatprep.subr.bf16.mxu1 %v3561_v51 }
 0x4b2   :  { %3447 = vmatmul.mubr.msk.f32.gmra.mrb[10].mxu1 %vm1805_vm11, %v2013_v46 }
 0x4b3   :  { %2809 = vmatpush1.bf16.msra.mxu1 %v3559_v53 }
 0x4b4   :  { %2810 = vmatprep.subr.bf16.mxu1 %v3567_v55 }
 0x4b7   :  { %2811 = vmatpush1.bf16.msra.mxu1 %v3565_v57 }
 0x4b8   :  { %2812 = vmatprep.subr.bf16.mxu1 %v3573_v59 }
 0x4bb   :  { %2813 = vmatpush1.bf16.msra.mxu1 %v3571_v61 }
 0x4bc   :  { %2814 = vmatprep.subr.bf16.mxu1 %v3579_v63  ;;  %v3606_v63 = vld [vmem:[#allocation5 + $0x184] ss:$8 sps:$4 sm:$0xff]  }
 0x4bd   :  { %2863 = vmatprep.subr.bf16.mxu0 %v3606_v63 }
 0x4be   :  { %2864 = vmatpush1.bf16.msra.mxu0 %v3604_v62 }
 0x4bf   :  { %2815 = vmatpush1.bf16.msra.mxu1 %v3577_v2 }
 0x4c0   :  { %2816 = vmatprep.subr.bf16.mxu1 %v3585_v4 }
 0x4c3   :  { %2817 = vmatpush1.bf16.msra.mxu1 %v3583_v6 }
 0x4c4   :  { %2818 = vmatprep.subr.bf16.mxu1 %v3591_v8 }
 0x4c7   :  { %2819 = vmatpush1.bf16.msra.mxu1 %v3589_v9  ;;  %v3609_v9 = vld [vmem:[#allocation5 + $0x94] ss:$8 sps:$4 sm:$0xff]  }
 0x4c8   :  { %2820 = vmatprep.subr.bf16.mxu1 %v3597_v30 }
 0x4cb   :  { %2821 = vmatpush1.bf16.msra.mxu1 %v3595_v29 }
 0x4cc   :  { %2822 = vmatprep.subr.bf16.mxu1 %v3603_v45 }
 0x4cf   :  { %2823 = vmatpush1.bf16.msra.mxu1 %v3601_v44 }
 0x4d0   :  { %2824 = vmatprep.subr.bf16.mxu1 %v3609_v9 }
 0x581   :  { %v3445_v16 = vpop.f32.mrb[8].mxu1 }
 0x582   :  { %v2126_v17 = vadd.f32 %v3445_v16, %v3105_v15  ;;  %v2095_v19 = vpop.f32.mrb[9].mxu1 }
 0x583   :  { %v2125_v20 = vadd.f32 %v3105_v15, %v2095_v19 }
 0x584   :  { %v2130_v21 = vmax.f32 %v2126_v17, 0.0 }
 0x585   :  { %v2129_v22 = vmax.f32 %v2125_v20, 0.0  ;;  %v3448_v0 = vpop.f32.mrb[10].mxu1 }
 0x586   :  { %v4049_v25 = vrot.slane %v2130_v21, %v4046_v18  ;;  %v2323_v26 = vcombine.high %v2130_v21, %v2130_v21  ;;  %v2128_v27 = vadd.f32 %v3448_v0, %v3105_v15  ;;  %v2105_v28 = vpop.f32.mrb[11].mxu1 }
 0x587   :  { %v4052_v31 = vrot.slane %v2129_v22, %v4046_v18  ;;  %v2203_v32 = vcombine.high %v2129_v22, %v2129_v22  ;;  %v2127_v33 = vadd.f32 %v3105_v15, %v2105_v28  ;;  %v3607_v15 = vld [vmem:[#allocation5 + $0x90] ss:$8 sps:$4 sm:$0xff]  }
 0x588   :  { %v2288_v34 = vrot.slane %v4049_v25, 1  ;;  %v4057_v35 = vcombine.high %v4049_v25, %v4049_v25  ;;  %v4060_v36 = vrot.slane %v2323_v26, %v4046_v18  ;;  %v2132_v37 = vmax.f32 %v2128_v27, 0.0  ;;  %v3612_v26 = vld [vmem:[#allocation5 + $0x194] ss:$8 sps:$4 sm:$0xff]   ;;  %2825 = vmatpush1.bf16.msra.mxu1 %v3607_v15 }
 0x589   :  { %v2165_v40 = vrot.slane %v4052_v31, 1  ;;  %v4065_v41 = vcombine.high %v4052_v31, %v4052_v31  ;;  %v4068_v42 = vrot.slane %v2203_v32, %v4046_v18  ;;  %v2131_v43 = vmax.f32 %v2127_v33, 0.0  ;;  %v3615_v32 = vld [vmem:[#allocation5 + $0xa4] ss:$8 sps:$4 sm:$0xff]   ;;  %2865 = vmatprep.subr.bf16.mxu0 %v3612_v26 }
 0x58a   :  { %v2312_v46 = vrot.slane %v4057_v35, 1  ;;  %v2348_v47 = vrot.slane %v4060_v36, 1  ;;  %v4074_v48 = vcombine.high %v4060_v36, %v4060_v36  ;;  %v2278_v49 = vrot.slane %v2132_v37, %v4046_v18  ;;  %2866 = vmatpush1.bf16.msra.mxu0 %v3610_v24  ;;  %2826 = vmatprep.subr.bf16.mxu1 %v3615_v32  ;;  %v3633_v24 = vld [vmem:[#allocation5 + $0xd4] ss:$8 sps:$4 sm:$0xff]  }
 0x58b   :  { %v2191_v50 = vrot.slane %v4065_v41, 1  ;;  %v2228_v51 = vrot.slane %v4068_v42, 1  ;;  %v4081_v52 = vcombine.high %v4068_v42, %v4068_v42  ;;  %v2331_v53 = vcombine.high %v2132_v37, %v2132_v37 }
 0x58c   :  { %v2372_v54 = vrot.slane %v4074_v48, 1  ;;  %v4084_v55 = vcombine.high %v2278_v49, %v2278_v49  ;;  %v4087_v56 = vrot.slane %v2131_v43, %v4046_v18  ;;  %v2211_v57 = vcombine.high %v2131_v43, %v2131_v43  ;;  %2827 = vmatpush1.bf16.msra.mxu1 %v3613_v39  ;;  %v3642_v39 = vld [vmem:[#allocation5 + $0x1e4] ss:$8 sps:$4 sm:$0xff]  }
 0x58d   :  { %v2252_v58 = vrot.slane %v4081_v52, 1  ;;  %v4091_v59 = vrot.slane %v2331_v53, %v4046_v18  ;;  %v2291_v60 = vsel %vm2154_vm12, %v2278_v49, %v2288_v34  ;;  %v4094_v61 = vrot.slane %v2278_v49, 7 }
 0x58e   :  { %v4097_v1 = vrot.slane %v2211_v57, %v4046_v18  ;;  %v2292_v2 = vsel %vm2156_vm13, %v2278_v49, %v2291_v60  ;;  %v2168_v3 = vsel %vm2154_vm12, %v4087_v56, %v2165_v40  ;;  %v2178_v4 = vcombine.high %v4087_v56, %v4087_v56  ;;  %v3616_v60 = vld [vmem:[#allocation5 + $0x1a0] ss:$8 sps:$4 sm:$0xff]  }
 0x58f   :  { %v2293_v5 = vsel %vm2158_vm14, %v2278_v49, %v2292_v2  ;;  %v2169_v6 = vsel %vm2156_vm13, %v4087_v56, %v2168_v3  ;;  %v2351_v7 = vsel %vm2154_vm12, %v4091_v59, %v2348_v47  ;;  %v2303_v8 = vrot.slane %v4084_v55, 7  ;;  %v3618_v47 = vld [vmem:[#allocation5 + $0x1a4] ss:$8 sps:$4 sm:$0xff]   ;;  %v3621_v3 = vld [vmem:[#allocation5 + $0xb4] ss:$8 sps:$4 sm:$0xff]  }
 0x590   :  { %v2294_v10 = vsel %vm2160_vm15, %v2278_v49, %v2293_v5  ;;  %v2170_v11 = vsel %vm2158_vm14, %v4087_v56, %v2169_v6  ;;  %v2352_v12 = vsel %vm2156_vm13, %v4091_v59, %v2351_v7  ;;  %v2194_v13 = vsel %vm2154_vm12, %v2178_v4, %v2191_v50  ;;  %2867 = vmatprep.subr.bf16.mxu0 %v3618_v47  ;;  %v3619_v7 = vld [vmem:[#allocation5 + $0xb0] ss:$8 sps:$4 sm:$0xff]  }
 0x591   :  { %2295 = vrot.lane.b32.xlu1 %v2294_v10, %s3679_s13  ;;  %v2171_v16 = vsel %vm2160_vm15, %v4087_v56, %v2170_v11  ;;  %v2353_v17 = vsel %vm2158_vm14, %v4091_v59, %v2352_v12  ;;  %v2195_v19 = vsel %vm2156_vm13, %v2178_v4, %v2194_v13  ;;  %v2231_v20 = vsel %vm2154_vm12, %v4097_v1, %v2228_v51  ;;  %v3627_v12 = vld [vmem:[#allocation5 + $0xc4] ss:$8 sps:$4 sm:$0xff]   ;;  %v3643_v47 = vld [vmem:[#allocation5 + $0xf0] ss:$8 sps:$4 sm:$0xff]  }
 0x592   :  { %2172 = vrot.lane.b32.xlu0 %v2171_v16, %s3679_s13  ;;  %v2354_v21 = vsel %vm2160_vm15, %v4091_v59, %v2353_v17  ;;  %v2196_v22 = vsel %vm2158_vm14, %v2178_v4, %v2195_v19  ;;  %v2232_v0 = vsel %vm2156_vm13, %v4097_v1, %v2231_v20  ;;  %v2304_v23 = vsel %vm2154_vm12, %v2303_v8, %v4057_v35  ;;  %v3622_v16 = vld [vmem:[#allocation5 + $0x1b0] ss:$8 sps:$4 sm:$0xff]  }
 0x593   :  { %v2197_v27 = vsel %vm2160_vm15, %v2178_v4, %v2196_v22  ;;  %v2233_v28 = vsel %vm2158_vm14, %v4097_v1, %v2232_v0  ;;  %v2305_v29 = vsel %vm2156_vm13, %v2303_v8, %v2304_v23  ;;  %v2240_v30 = vcombine.high %v4097_v1, %v4097_v1  ;;  %2868 = vmatpush1.bf16.msra.mxu0 %v3616_v60  ;;  %v3625_v23 = vld [vmem:[#allocation5 + $0xc0] ss:$8 sps:$4 sm:$0xff]  }
 0x594   :  { %v2234_v33 = vsel %vm2160_vm15, %v4097_v1, %v2233_v28  ;;  %v2306_v34 = vsel %vm2158_vm14, %v2303_v8, %v2305_v29  ;;  %v2181_v37 = vrot.slane %v2178_v4, 7  ;;  %v2360_v38 = vcombine.high %v4091_v59, %v4091_v59  ;;  %2828 = vmatprep.subr.bf16.mxu1 %v3621_v3 }
 0x595   :  { %2355 = vrot.lane.b32.xlu1 %v2354_v21, %s3679_s13  ;;  %v2307_v40 = vsel %vm2160_vm15, %v2303_v8, %v2306_v34  ;;  %v2255_v43 = vsel %vm2154_vm12, %v2240_v30, %v2252_v58  ;;  %v2315_v44 = vsel %vm2154_vm12, %v4084_v55, %v2312_v46  ;;  %v2243_v45 = vrot.slane %v2240_v30, 7  ;;  %v3624_v8 = vld [vmem:[#allocation5 + $0x1b4] ss:$8 sps:$4 sm:$0xff]   ;;  %v3630_v21 = vld [vmem:[#allocation5 + $0x1c4] ss:$8 sps:$4 sm:$0xff]   ;;  %2829 = vmatpush1.bf16.msra.mxu1 %v3619_v7 }
 0x596   :  { %2198 = vrot.lane.b32.xlu0 %v2197_v27, %s3680_s7  ;;  %v2256_v49 = vsel %vm2156_vm13, %v2240_v30, %v2255_v43  ;;  %v2182_v50 = vsel %vm2154_vm12, %v2181_v37, %v4065_v41  ;;  %v2363_v51 = vrot.slane %v2360_v38, 7  ;;  %v2316_v53 = vsel %vm2156_vm13, %v4084_v55, %v2315_v44  ;;  %2869 = vmatprep.subr.bf16.mxu0 %v3624_v8  ;;  %v3628_v27 = vld [vmem:[#allocation5 + $0x1c0] ss:$8 sps:$4 sm:$0xff]   ;;  %v3645_v43 = vld [vmem:[#allocation5 + $0xf4] ss:$8 sps:$4 sm:$0xff]  }
 0x597   :  { %v2257_v35 = vsel %vm2158_vm14, %v2240_v30, %v2256_v49  ;;  %v2183_v46 = vsel %vm2156_vm13, %v2181_v37, %v2182_v50  ;;  %v2317_v57 = vsel %vm2158_vm14, %v4084_v55, %v2316_v53  ;;  %v2244_v58 = vsel %vm2154_vm12, %v2243_v45, %v4081_v52  ;;  %2830 = vmatprep.subr.bf16.mxu1 %v3627_v12  ;;  %v3640_v44 = vld [vmem:[#allocation5 + $0x1e0] ss:$8 sps:$4 sm:$0xff]   ;;  %v3646_v49 = vld [vmem:[#allocation5 + $0x1f0] ss:$8 sps:$4 sm:$0xff]  }
 0x598   :  { %v2258_v62 = vsel %vm2160_vm15, %v2240_v30, %v2257_v35  ;;  %v2184_v41 = vsel %vm2158_vm14, %v2181_v37, %v2183_v46  ;;  %v2364_v63 = vsel %vm2154_vm12, %v2363_v51, %v4074_v48  ;;  %v2318_v2 = vsel %vm2160_vm15, %v4084_v55, %v2317_v57  ;;  %2870 = vmatpush1.bf16.msra.mxu0 %v3622_v16  ;;  %v3636_v30 = vld [vmem:[#allocation5 + $0x1d4] ss:$8 sps:$4 sm:$0xff]   ;;  %v2906_v50 = vld [vmem:[%s4346_s16 + $0x80] sm:$0xff]  ;;  %v2909_v12 = vld [vmem:[%s4346_s16 + $0x98] sm:$0xff] }
 0x599   :  { %2235 = vrot.lane.b32.xlu1 %v2234_v33, %s3679_s13  ;;  %v2185_v4 = vsel %vm2160_vm15, %v2181_v37, %v2184_v41  ;;  %v2365_v52 = vsel %vm2156_vm13, %v2363_v51, %v2364_v63  ;;  %v2245_v5 = vsel %vm2156_vm13, %v2243_v45, %v2244_v58  ;;  %v2375_v6 = vsel %vm2154_vm12, %v2360_v38, %v2372_v54  ;;  %v3639_v37 = vld [vmem:[#allocation5 + $0xe4] ss:$8 sps:$4 sm:$0xff]  }
 0x59a   :  { %2308 = vrot.lane.b32.xlu0 %v2307_v40, %s3681_s20  ;;  %v2366_v55 = vsel %vm2158_vm14, %v2363_v51, %v2365_v52  ;;  %v2246_v9 = vsel %vm2158_vm14, %v2243_v45, %v2245_v5  ;;  %v2376_v10 = vsel %vm2156_vm13, %v2360_v38, %v2375_v6  ;;  %v2282_v11 = vsel %vm2154_vm12, %v4094_v61, %v4049_v25  ;;  %v3637_v40 = vld [vmem:[#allocation5 + $0xe0] ss:$8 sps:$4 sm:$0xff]  }
 0x59b   :  { %v2367_v48 = vsel %vm2160_vm15, %v2363_v51, %v2366_v55  ;;  %v2247_v54 = vsel %vm2160_vm15, %v2243_v45, %v2246_v9  ;;  %v2377_v13 = vsel %vm2158_vm14, %v2360_v38, %v2376_v10  ;;  %v2283_v15 = vsel %vm2156_vm13, %v4094_v61, %v2282_v11  ;;  %2871 = vmatprep.subr.bf16.mxu0 %v3630_v21  ;;  %v3648_v45 = vld [vmem:[#allocation5 + $0x1f4] ss:$8 sps:$4 sm:$0xff]   ;;  %v2890_v8 = vld [vmem:[%s4346_s16] sm:$0xff] }
 0x59c   :  { %v2378_v17 = vsel %vm2160_vm15, %v2360_v38, %v2377_v13  ;;  %v2284_v19 = vsel %vm2158_vm14, %v4094_v61, %v2283_v15  ;;  %v2153_v20 = vrot.slane %v4087_v56, 7  ;;  %v2341_v25 = vrot.slane %v4091_v59, 7  ;;  %2831 = vmatpush1.bf16.msra.mxu1 %v3625_v23  ;;  %2872 = vmatpush1.bf16.msra.mxu0 %v3628_v27  ;;  %v3634_v38 = vld [vmem:[#allocation5 + $0x1d0] ss:$8 sps:$4 sm:$0xff]   ;;  %v2894_v23 = vld [vmem:[%s4346_s16 + $0x20] sm:$0xff]  ;;  %v2897_v27 = vld [vmem:[%s4346_s16 + $0x38] sm:$0xff] }
 0x59d   :  { %2259 = vrot.lane.b32.xlu1 %v2258_v62, %s3680_s7  ;;  %v2285_v22 = vsel %vm2160_vm15, %v4094_v61, %v2284_v19  ;;  %v2221_v0 = vrot.slane %v4097_v1, 7  ;;  %2832 = vmatprep.subr.bf16.mxu1 %v3633_v24  ;;  %v2907_v51 = vld [vmem:[%s4346_s16 + $0x88] sm:$0xff]  ;;  %v2908_v11 = vld [vmem:[%s4346_s16 + $0x90] sm:$0xff]  ;;  %v2913_v24 = vld [vmem:[%s4346_s16 + $0xb8] sm:$0xff] }
 0x59e   :  { %2186 = vrot.lane.b32.xlu0 %v2185_v4, %s3681_s20  ;;  %2287 = vst.msk [vmem:[#allocation4 + $0x4] sm:$0x3] %vm2163_vm0, %v2285_v22  ;;  %v2155_v56 = vsel %vm2154_vm12, %v2153_v20, %v4052_v31  ;;  %v2342_v59 = vsel %vm2154_vm12, %v2341_v25, %v4060_v36  ;;  %2873 = vmatprep.subr.bf16.mxu0 %v3636_v30  ;;  %v2891_v55 = vld [vmem:[%s4346_s16 + $0x8] sm:$0xff] }
 0x59f   :  { %v2157_v26 = vsel %vm2156_vm13, %v2153_v20, %v2155_v56  ;;  %v2343_v61 = vsel %vm2156_vm13, %v2341_v25, %v2342_v59  ;;  %v2222_v1 = vsel %vm2154_vm12, %v2221_v0, %v4068_v42  ;;  %v3631_v42 = vld [vmem:[#allocation5 + $0xd0] ss:$8 sps:$4 sm:$0xff]   ;;  %v3461_v53 = vpack.c.bf16 %v2907_v51, %v2906_v50 }
 0x5a0   :  { %v2159_v28 = vsel %vm2158_vm14, %v2153_v20, %v2157_v26  ;;  %v2344_v29 = vsel %vm2158_vm14, %v2341_v25, %v2343_v61  ;;  %v2223_v31 = vsel %vm2156_vm13, %v2221_v0, %v2222_v1  ;;  %2833 = vmatpush1.bf16.msra.mxu1 %v3631_v42  ;;  %2874 = vmatpush1.bf16.msra.mxu0 %v3634_v38  ;;  %v2895_v56 = vld [vmem:[%s4346_s16 + $0x28] sm:$0xff]  ;;  %v2912_v59 = vld [vmem:[%s4346_s16 + $0xb0] sm:$0xff]  ;;  %v2917_v42 = vld [vmem:[%s4346_s16 + $0xd8] sm:$0xff] }
 0x5a1   :  { %2368 = vrot.lane.b32.xlu1 %v2367_v48, %s3681_s20  ;;  %v2161_v36 = vsel %vm2160_vm15, %v2153_v20, %v2159_v28  ;;  %v2345_v32 = vsel %vm2160_vm15, %v2341_v25, %v2344_v29  ;;  %v2224_v33 = vsel %vm2158_vm14, %v2221_v0, %v2223_v31  ;;  %2834 = vmatprep.subr.bf16.mxu1 %v3639_v37  ;;  %v2910_v20 = vld [vmem:[%s4346_s16 + $0xa0] sm:$0xff]  ;;  %v2911_v25 = vld [vmem:[%s4346_s16 + $0xa8] sm:$0xff]  ;;  %v2896_v1 = vld [vmem:[%s4346_s16 + $0x30] sm:$0xff] }
 0x5a2   :  { %2319 = vrot.lane.b32.xlu0 %v2318_v2, %s3680_s7  ;;  %2164 = vst.msk [vmem:[#allocation4] sm:$0x3] %vm2163_vm0, %v2161_v36  ;;  %2347 = vst.msk [vmem:[#allocation4 + $0x6] sm:$0x3] %vm2163_vm0, %v2345_v32  ;;  %v2225_v34 = vsel %vm2160_vm15, %v2221_v0, %v2224_v33  ;;  %2875 = vmatprep.subr.bf16.mxu0 %v3642_v39  ;;  %v3463_v13 = vpack.c.bf16 %v2891_v55, %v2890_v8  ;;  %v2914_v28 = vld [vmem:[%s4346_s16 + $0xc0] sm:$0xff]  ;;  %v2915_v29 = vld [vmem:[%s4346_s16 + $0xc8] sm:$0xff] }
 0x5a3   :  { %2227 = vst.msk [vmem:[#allocation4 + $0x2] sm:$0x3] %vm2163_vm0, %v2225_v34  ;;  %v3465_v16 = vpack.c.bf16 %v2909_v12, %v2908_v11  ;;  %v3469_v0 = vpack.c.bf16 %v2911_v25, %v2910_v20  ;;  %v3471_v26 = vpack.c.bf16 %v2895_v56, %v2894_v23  ;;  %v3473_v61 = vpack.c.bf16 %v2913_v24, %v2912_v59  ;;  %v2898_v36 = vld [vmem:[%s4346_s16 + $0x40] sm:$0xff]  ;;  %v2899_v32 = vld [vmem:[%s4346_s16 + $0x48] sm:$0xff]  ;;  %v2916_v33 = vld [vmem:[%s4346_s16 + $0xd0] sm:$0xff] }
 0x5a4   :  { %2835 = vmatpush1.bf16.msra.mxu1 %v3637_v40  ;;  %2876 = vmatpush1.bf16.msra.mxu0 %v3640_v44  ;;  %v3475_v31 = vpack.c.bf16 %v2897_v27, %v2896_v1  ;;  %v3477_v30 = vpack.c.bf16 %v2915_v29, %v2914_v28  ;;  %v3479_v34 = vpack.c.bf16 %v2899_v32, %v2898_v36  ;;  %v2900_v38 = vld [vmem:[%s4346_s16 + $0x50] sm:$0xff]  ;;  %v2901_v39 = vld [vmem:[%s4346_s16 + $0x58] sm:$0xff]  ;;  %v2919_v44 = vld [vmem:[%s4346_s16 + $0xe8] sm:$0xff] }
 0x5a5   :  { %2248 = vrot.lane.b32.xlu1 %v2247_v54, %s3681_s20  ;;  %2836 = vmatprep.subr.bf16.mxu1 %v3645_v43  ;;  %v3481_v37 = vpack.c.bf16 %v2917_v42, %v2916_v33  ;;  %v3483_v40 = vpack.c.bf16 %v2901_v39, %v2900_v38  ;;  %v2918_v43 = vld [vmem:[%s4346_s16 + $0xe0] sm:$0xff]  ;;  %v2920_v51 = vld [vmem:[%s4346_s16 + $0xf0] sm:$0xff] }
 0x5a6   :  { %2877 = vmatprep.subr.bf16.mxu0 %v3648_v45  ;;  %v3485_v45 = vpack.c.bf16 %v2919_v44, %v2918_v43 }
 0x5a8   :  { %2837 = vmatpush1.bf16.msra.mxu1 %v3643_v47  ;;  %2878 = vmatpush1.bf16.msra.mxu0 %v3646_v49  ;;  %v2902_v47 = vld [vmem:[%s4346_s16 + $0x60] sm:$0xff]  ;;  %v2903_v49 = vld [vmem:[%s4346_s16 + $0x68] sm:$0xff] }
 0x5a9   :  { %2379 = vrot.lane.b32.xlu1 %v2378_v17, %s3680_s7  ;;  %3462 = vmatprep.subr.bf16.mxu1 %v3461_v53  ;;  %v2892_v17 = vld [vmem:[%s4346_s16 + $0x10] sm:$0xff]  ;;  %v3487_v50 = vpack.c.bf16 %v2903_v49, %v2902_v47  ;;  %v2921_v53 = vld [vmem:[%s4346_s16 + $0xf8] sm:$0xff] }
 0x603   :  { %v2296_v35 = vpop.permute.xlu1 %2295 }
 0x604   :  { %2298 = vst.msk [vmem:[#allocation4 + $0x4] sm:$0x3] %vm2175_vm1, %v2296_v35  ;;  %v2173_v46 = vpop.permute.xlu0 %2172  ;;  %v2904_v35 = vld [vmem:[%s4346_s16 + $0x70] sm:$0xff] }
 0x605   :  { %2176 = vst.msk [vmem:[#allocation4] sm:$0x3] %vm2175_vm1, %v2173_v46  ;;  %v3489_v46 = vpack.c.bf16 %v2921_v53, %v2920_v51 }
 0x607   :  { %v2356_v57 = vpop.permute.xlu1 %2355 }
 0x608   :  { %2358 = vst.msk [vmem:[#allocation4 + $0x6] sm:$0x3] %vm2175_vm1, %v2356_v57  ;;  %v2199_v58 = vpop.permute.xlu0 %2198  ;;  %v2905_v57 = vld [vmem:[%s4346_s16 + $0x78] sm:$0xff] }
 0x60b   :  { %v2236_v60 = vpop.permute.xlu1 %2235 }
 0x60c   :  { %2238 = vst.msk [vmem:[#allocation4 + $0x2] sm:$0x3] %vm2175_vm1, %v2236_v60  ;;  %v2309_v62 = vpop.permute.xlu0 %2308  ;;  %v2478_v60 = vsub.s32 0, %v4040_v14 }
 0x60d   :  { %2311 = vst.msk [vmem:[#allocation4 + $0x4] sm:$0x3] %vm2189_vm2, %v2309_v62  ;;  %v2474_v62 = vld [vmem:[%s4345_s15] sm:$0x3] }
 0x60f   :  { %v2260_v41 = vpop.permute.xlu1 %2259 }
 0x610   :  { %v2187_v63 = vpop.permute.xlu0 %2186 }
 0x611   :  { %2190 = vst.msk [vmem:[#allocation4] sm:$0x3] %vm2189_vm2, %v2187_v63  ;;  %v2479_v63 = vrot.slane %v2474_v62, %v2478_v60 }
 0x612   :  { %2202 = vst.msk [vmem:[#allocation4] sm:$0x3] %vm2201_vm3, %v2199_v58  ;;  %v3491_v58 = vpack.c.bf16 %v2905_v57, %v2904_v35 }
 0x613   :  { %v2369_v2 = vpop.permute.xlu1 %2368 }
 0x614   :  { %2371 = vst.msk [vmem:[#allocation4 + $0x6] sm:$0x3] %vm2189_vm2, %v2369_v2  ;;  %v2320_v3 = vpop.permute.xlu0 %2319 }
 0x615   :  { %2322 = vst.msk [vmem:[#allocation4 + $0x4] sm:$0x3] %vm2201_vm3, %v2320_v3 }
 0x617   :  { %v2249_v4 = vpop.permute.xlu1 %2248 }
 0x618   :  { %2251 = vst.msk [vmem:[#allocation4 + $0x2] sm:$0x3] %vm2189_vm2, %v2249_v4 }
 0x619   :  { %2262 = vst.msk [vmem:[#allocation4 + $0x2] sm:$0x3] %vm2201_vm3, %v2260_v41  ;;  %v2482_v41 = vsub.s32 1, %v4040_v14  ;;  %v3170_v14 = vld [vmem:[%s4347_s17] ss:$0 sm:$0xff] }
 0x61b   :  { %v2380_v52 = vpop.permute.xlu1 %2379  ;;  %v2483_v2 = vrot.slane %v2474_v62, %v2482_v41 }
 0x61c   :  { %2382 = vst.msk [vmem:[#allocation4 + $0x6] sm:$0x3] %vm2201_vm3, %v2380_v52 }
 0x623   :  { %v2383_v5 = vld [vmem:[#allocation4] sm:$0xff] }
 0x624   :  { %v2392_v6 = vrot.slane %v2383_v5, %v4046_v18  ;;  %v2385_v7 = vcombine.high %v2383_v5, %v2383_v5 }
 0x626   :  { %v2400_v9 = vcombine.high %v2392_v6, %v2392_v6  ;;  %v2399_v10 = vrot.slane %v2385_v7, %v4046_v18  ;;  %v2406_v15 = vpack.c.bf16 %v2392_v6, %v2392_v6  ;;  %v2893_v18 = vld [vmem:[%s4346_s16 + $0x18] sm:$0xff] }
 0x627   :  { %v3467_v22 = vpack.c.bf16 %v2893_v18, %v2892_v17 }
 0x628   :  { %v2407_v48 = vpack.c.bf16 %v2400_v9, %v2400_v9  ;;  %v2401_v54 = vcombine.high %v2399_v10, %v2399_v10  ;;  %v2408_v21 = vpack.c.bf16 %v2399_v10, %v2399_v10 }
 0x62a   :  { %2838 = vmatprep.mubr.bf16.mxu1 %v2407_v48  ;;  %v2409_v19 = vpack.c.bf16 %v2401_v54, %v2401_v54 }
 0x62b   :  { %2839 = vmatmul.mubr.bf16.vlgmr.msra.gmra.mrb[12].mxu1 %v2406_v15 }
 0x62c   :  { %2879 = vmatprep.mubr.bf16.mxu0 %v2409_v19  ;;  %3464 = vmatpush3.bf16.msra.mxu1 %v3463_v13 }
 0x62d   :  { %2880 = vmatmul.mubr.bf16.vlgmr.msra.gmra.mrb[16].mxu0 %v2408_v21  ;;  %3466 = vmatprep.subr.bf16.mxu1 %v3465_v16 }
 0x630   :  { %3468 = vmatpush3.bf16.msra.mxu1 %v3467_v22 }
 0x631   :  { %3470 = vmatprep.subr.bf16.mxu1 %v3469_v0 }
 0x634   :  { %3472 = vmatpush3.bf16.msra.mxu1 %v3471_v26 }
 0x635   :  { %3474 = vmatprep.subr.bf16.mxu1 %v3473_v61 }
 0x638   :  { %3476 = vmatpush3.bf16.msra.mxu1 %v3475_v31 }
 0x639   :  { %3478 = vmatprep.subr.bf16.mxu1 %v3477_v30 }
 0x63c   :  { %3480 = vmatpush3.bf16.msra.mxu1 %v3479_v34 }
 0x63d   :  { %3482 = vmatprep.subr.bf16.mxu1 %v3481_v37 }
 0x640   :  { %3484 = vmatpush3.bf16.msra.mxu1 %v3483_v40 }
 0x641   :  { %3486 = vmatprep.subr.bf16.mxu1 %v3485_v45 }
 0x644   :  { %3488 = vmatpush3.bf16.msra.mxu1 %v3487_v50 }
 0x645   :  { %3490 = vmatprep.subr.bf16.mxu1 %v3489_v46 }
 0x648   :  { %3492 = vmatpush3.bf16.msra.mxu1 %v3491_v58 }
 0x6fe   :  { %v2840_v3 = vpop.f32.mrb[12].mxu1 }
 0x6ff   :  { %v2841_v4 = vadd.f32 %v2840_v3, %v2479_v63  ;;  %v2842_v52 = vpop.f32.mrb[13].mxu1 }
 0x700   :  { %v2843_v5 = vadd.f32 %v2842_v52, %v2483_v2  ;;  %v2844_v6 = vpop.f32.mrb[14].mxu1  ;;  %v2881_v7 = vpop.f32.mrb[16].mxu0 }
 0x701   :  { %v2882_v8 = vadd.f32 %v2881_v7, %v2841_v4  ;;  %v2845_v55 = vpop.f32.mrb[15].mxu1  ;;  %v2883_v9 = vpop.f32.mrb[17].mxu0 }
 0x702   :  { %v2884_v10 = vadd.f32 %v2883_v9, %v2843_v5  ;;  %v2885_v11 = vpop.f32.mrb[18].mxu0 }
 0x703   :  { %v2886_v12 = vpop.f32.mrb[19].mxu0  ;;  %v2888_v54 = vmax.f32 %v2882_v8, 0.0 }
 0x704   :  { %v2889_v48 = vmax.f32 %v2884_v10, 0.0 }
 0x706   :  { %2993 = vmatprep.mubr.f32.mxu1 %v2889_v48 }
 0x707   :  { %2994 = vmatmul.mubr.f32.vlgmr.msra.gmra.mrb[16].mxu1 %v2888_v54 }
 0x7da   :  { %v3296_v13 = vpop.f32.mrb[16].mxu1 }
 0x7db   :  { %v3297_v15 = vpop.f32.mrb[17].mxu1 }
 0x7dc   :  { %v3298_v16 = vadd.f32 %v3297_v15, %v3296_v13 }
 0x7de   :  { %v2996_v17 = vadd.f32 %v3298_v16, %v3170_v14 }
 0x7e0   :  { %2999 = vst.msk [vmem:[%s4348_s18] sm:$0x3] %vm772_vm5, %v2996_v17 }
 0x7e1   :  { %3004 = vsyncpa [#allocation6], 1 }

</bundles_post_ra>
